<compile_context>
chip_gen: v6e
topology: v6e:2x2x1
jax: 0.10.0
libtpu: 0.0.40
codegen_flags: <defaults>
</compile_context>

<pallas_src>
import functools
import math

import numpy as np
import jax
import jax.numpy as jnp
from jax.experimental import pallas as pl
from jax.experimental.pallas import tpu as pltpu


def _round_up(x, m):
    return (x + m - 1) // m * m


def _vmem_capacity_bytes():
    """Physical VMEM per TensorCore; conservative fallback if the query fails."""
    try:
        info = pltpu.get_tpu_info()
        cap = getattr(info, "vmem_capacity_bytes", None)
        if cap:
            return int(cap)
    except Exception:
        pass
    return 64 * 1024 * 1024  # v7x per-core size: safe lower bound


def _row_alignment(c_in, c_out):
    """Smallest tb such that tb*c_in and tb*c_out are both multiples of 8."""
    a_in = 8 // math.gcd(8, c_in)
    a_out = 8 // math.gcd(8, c_out)
    return a_in * a_out // math.gcd(a_in, a_out)


def _step_vmem_bytes(tb, c_in, c_out, n, mp, dft_sz, out_sz):
    """Rough per-grid-step VMEM residency (blocks + constants + intermediates)."""
    x_blk = 2 * tb * c_in * n * dft_sz                # double-buffered input block
    o_blk = 2 * tb * c_out * n * out_sz               # double-buffered output block
    bases = 2 * 4 * mp * n * dft_sz                   # worst case: double-buffered
    wts = 2 * 2 * mp * c_in * 2 * c_out * dft_sz
    inter = (2 * mp * tb * c_in * (4 + dft_sz)        # fr/fi (f32) + xr/xi
             + mp * tb * 2 * c_out * (4 + dft_sz)     # g (f32) + gr/gi
             + tb * c_out * n * 4)                    # y (f32) before the store
    return x_blk + o_blk + bases + wts + inter


def _pick_batch_tile(B, c_in, c_out, n, mp, dft_sz, out_sz, budget, target_rows=256):
    """Fold batch elements so the forward-DFT matmul has ~target_rows LHS rows.

    256 matches the v6e/v7x MXU width (and is a multiple of v5e's 128).  tb is
    kept sublane-aligned (tb*C % 8 == 0) so the 2-D row blocks satisfy the
    (8, 128) block rule, and shrunk if a grid step exceeds the VMEM budget.
    """
    align = _row_alignment(c_in, c_out)
    tb = _round_up(max(1, -(-target_rows // c_in)), align)
    tb = min(tb, _round_up(B, align))
    while tb > align and _step_vmem_bytes(tb, c_in, c_out, n, mp, dft_sz, out_sz) > budget:
        new_tb = _round_up(max(align, tb // 2), align)
        if new_tb >= tb:
            break
        tb = new_tb
    # TODO(synk): per-generation refinements -- even grid-step count on v7x
    # (2 TensorCores share the batch axis), N-tiling for very large N.
    return tb


@functools.lru_cache(maxsize=None)
def _dft_bases(N, M, Mp, dtype_name):
    """Truncated real-DFT bases, built once on host in float64.

    Returns (bcos, bnsin, binvc, binvs), each (Mp, N):
      bcos[k]  = cos(2*pi*k*n/N)            (forward, Re)
      bnsin[k] = -sin(2*pi*k*n/N)           (forward, Im)
      binvc[k] = c_k * cos(2*pi*k*n/N) / N  (inverse, from Re)
      binvs[k] = -c_k * sin(2*pi*k*n/N) / N (inverse, from Im)
    Rows k >= M are zero (mode padding).  Sine rows for k == 0 and the Nyquist
    mode are zeroed exactly, matching rfft/irfft real-only-bin semantics.
    """
    n = np.arange(N)
    k = np.arange(M)
    # (k*n) mod N keeps the angle argument small so accuracy is independent of N*M.
    ang = 2.0 * np.pi * (np.outer(k, n) % N).astype(np.float64) / N
    cos, sin = np.cos(ang), np.sin(ang)
    real_only = (k == 0) | ((2 * k == N) & (N % 2 == 0))
    sin[real_only] = 0.0
    c = np.where(real_only, 1.0, 2.0)

    bcos = np.zeros((Mp, N), np.float64)
    bnsin = np.zeros((Mp, N), np.float64)
    binvc = np.zeros((Mp, N), np.float64)
    binvs = np.zeros((Mp, N), np.float64)
    bcos[:M] = cos
    bnsin[:M] = -sin
    binvc[:M] = c[:, None] * cos / N
    binvs[:M] = -(c[:, None] * sin) / N

    dt = jnp.dtype(dtype_name)
    return tuple(jnp.asarray(b, dtype=dt) for b in (bcos, bnsin, binvc, binvs))


def _spectral_conv_kernel(x_ref, bcos_ref, bnsin_ref, wtop_ref, wbot_ref,
                          binvc_ref, binvs_ref, o_ref):
    R, N = x_ref.shape                      # R = TB * C_in (batch-major rows)
    Mp, C_in, C_out2 = wtop_ref.shape
    C_out = C_out2 // 2
    TB = R // C_in
    mix_dt = wtop_ref.dtype
    dft_dt = binvc_ref.dtype

    x2 = x_ref[...]                                               # (R, N), matmul dtype

    # Forward truncated real DFT: two MXU matmuls, contraction over N,
    # lane dim = R (~256 by construction).
    dn_fwd = (((1,), (1,)), ((), ()))
    fr = jax.lax.dot_general(bcos_ref[...], x2, dn_fwd,
                             preferred_element_type=jnp.float32)  # (Mp, R)  Re
    fi = jax.lax.dot_general(bnsin_ref[...], x2, dn_fwd,
                             preferred_element_type=jnp.float32)  # (Mp, R)  Im

    # Complex channel mixing, mode-batched on the MXU.  The 2x2 real block form
    # of the weights is fused along output channels, so two matmuls emit
    # [O_re | O_im] directly (2*C_out lanes) with no activation concatenate.
    xr = fr.astype(mix_dt).reshape(Mp, TB, C_in)
    xi = fi.astype(mix_dt).reshape(Mp, TB, C_in)
    dn_mix = (((2,), (1,)), ((0,), (0,)))        # contract C_in, batch over modes
    g = (jax.lax.dot_general(xr, wtop_ref[...], dn_mix,
                             preferred_element_type=jnp.float32)
         + jax.lax.dot_general(xi, wbot_ref[...], dn_mix,
                               preferred_element_type=jnp.float32))
    # g: (Mp, TB, 2*C_out) = [O_re | O_im] along the last axis.

    gr = g[:, :, :C_out].astype(dft_dt).reshape(Mp, TB * C_out)
    gi = g[:, :, C_out:].astype(dft_dt).reshape(Mp, TB * C_out)

    # Inverse truncated real DFT: two MXU matmuls, contraction over modes,
    # output lane dim = N (lane-dense store, no final reshape).
    dn_inv = (((0,), (0,)), ((), ()))
    y = (jax.lax.dot_general(gr, binvc_ref[...], dn_inv,
                             preferred_element_type=jnp.float32)
         + jax.lax.dot_general(gi, binvs_ref[...], dn_inv,
                               preferred_element_type=jnp.float32))  # (TB*C_out, N)
    o_ref[...] = y.astype(o_ref.dtype)


def spectral_conv1d(x, weights, *, dft_dtype=jnp.bfloat16, out_dtype=jnp.float32,
                    batch_tile=None):
    """FNO SpectralConv1d forward.

    x: (B, C_in, N); weights: (C_in, C_out, modes1, 2).  Returns (B, C_out, N)
    in `out_dtype` (float32 by default).  dft_dtype=bfloat16 is the fast path
    (bases, x and mixing weights in bf16, f32 accumulation); float32 gives a
    tight-tolerance path.
    """
    B, C_in, N = x.shape
    w_cin, C_out, M, two = weights.shape
    assert w_cin == C_in and two == 2 and M <= N // 2 + 1

    dft_dtype = jnp.dtype(dft_dtype)
    out_dtype = jnp.dtype(out_dtype)
    Mp = _round_up(M, 8)                       # sublane-aligned mode padding

    bcos, bnsin, binvc, binvs = _dft_bases(N, M, Mp, dft_dtype.name)

    # 2x2 real block form of the complex weights, fused along output channels,
    # mode-major and zero-padded to Mp modes:
    #   wtop = [Wr | Wi],  wbot = [-Wi | Wr]   -> (Mp, C_in, 2*C_out)
    wr = jnp.transpose(weights[..., 0], (2, 0, 1)).astype(jnp.float32)
    wi = jnp.transpose(weights[..., 1], (2, 0, 1)).astype(jnp.float32)
    pad = ((0, Mp - M), (0, 0), (0, 0))
    wtop = jnp.pad(jnp.concatenate([wr, wi], axis=-1), pad).astype(dft_dtype)
    wbot = jnp.pad(jnp.concatenate([-wi, wr], axis=-1), pad).astype(dft_dtype)

    capacity = _vmem_capacity_bytes()
    vmem_limit = max(16 * 1024 * 1024, capacity - 8 * 1024 * 1024)
    tile_budget = max(8 * 1024 * 1024, capacity - 16 * 1024 * 1024)

    dft_sz = dft_dtype.itemsize
    out_sz = out_dtype.itemsize
    align = _row_alignment(C_in, C_out)
    if batch_tile is not None:
        TB = min(_round_up(batch_tile, align), _round_up(B, align))
    else:
        TB = _pick_batch_tile(B, C_in, C_out, N, Mp, dft_sz, out_sz, tile_budget)
    Bp = _round_up(B, TB)                      # pad B instead of shrinking TB
    grid = (Bp // TB,)

    # HBM-side layout plumbing (one-off): flatten to row-major 2-D and cast x
    # to the matmul dtype once, so no per-step reshapes/casts run in-kernel.
    x2 = x.reshape(B * C_in, N).astype(dft_dtype)
    if Bp != B:
        x2 = jnp.pad(x2, ((0, (Bp - B) * C_in), (0, 0)))

    flops = (4 * Bp * C_in * Mp * N            # forward DFT
             + 8 * Bp * C_in * C_out * Mp      # complex channel mixing
             + 4 * Bp * C_out * Mp * N)        # inverse DFT
    bytes_accessed = (Bp * C_in * N * dft_sz + Bp * C_out * N * out_sz
                      + 4 * Mp * N * dft_sz + 2 * Mp * C_in * 2 * C_out * dft_sz)

    def _run(single_buffer_consts):
        const_kwargs = {}
        if single_buffer_consts and hasattr(pl, "Buffered"):
            # Grid-invariant inputs: no need to double-buffer them.
            const_kwargs = dict(pipeline_mode=pl.Buffered(1))
        in_specs = [
            pl.BlockSpec((TB * C_in, N), lambda b: (b, 0)),
            pl.BlockSpec((Mp, N), lambda b: (0, 0), **const_kwargs),
            pl.BlockSpec((Mp, N), lambda b: (0, 0), **const_kwargs),
            pl.BlockSpec((Mp, C_in, 2 * C_out), lambda b: (0, 0, 0), **const_kwargs),
            pl.BlockSpec((Mp, C_in, 2 * C_out), lambda b: (0, 0, 0), **const_kwargs),
            pl.BlockSpec((Mp, N), lambda b: (0, 0), **const_kwargs),
            pl.BlockSpec((Mp, N), lambda b: (0, 0), **const_kwargs),
        ]
        out_specs = pl.BlockSpec((TB * C_out, N), lambda b: (b, 0))
        return pl.pallas_call(
            _spectral_conv_kernel,
            out_shape=jax.ShapeDtypeStruct((Bp * C_out, N), out_dtype),
            grid_spec=pltpu.PrefetchScalarGridSpec(
                num_scalar_prefetch=0,
                grid=grid,
                in_specs=in_specs,
                out_specs=out_specs,
            ),
            compiler_params=pltpu.CompilerParams(
                dimension_semantics=("parallel",),
                vmem_limit_bytes=int(vmem_limit),
            ),
            cost_estimate=pl.CostEstimate(flops=int(flops), transcendentals=0,
                                          bytes_accessed=int(bytes_accessed)),
        )(x2, bcos, bnsin, wtop, wbot, binvc, binvs)

    try:
        y2 = _run(True)
    except Exception:
        # pl.Buffered(1) pipeline_mode unsupported on this JAX version; fall
        # back to default double-buffered constants (correctness unchanged).
        y2 = _run(False)

    y = y2.reshape(Bp, C_out, N)
    if Bp != B:
        y = y[:B]
    return y


def _reference(x, weights):
    """Pure-JAX replica of the PyTorch forward (rfft -> mode mix -> irfft)."""
    B, C_in, N = x.shape
    _, C_out, M, _ = weights.shape
    x_ft = jnp.fft.rfft(x, axis=-1)                               # (B, C_in, N//2+1)
    w_cplx = weights[..., 0] + 1j * weights[..., 1]               # (C_in, C_out, M)
    mixed = jnp.einsum('bix,iox->box', x_ft[:, :, :M], w_cplx)    # (B, C_out, M)
    out_ft = jnp.zeros((B, C_out, N // 2 + 1), dtype=jnp.complex64)
    out_ft = out_ft.at[:, :, :M].set(mixed)
    return jnp.fft.irfft(out_ft, n=N, axis=-1)                    # (B, C_out, N)


if __name__ == "__main__":
    B, C_in, C_out, N, modes1 = 2, 4, 4, 16, 8

    key = jax.random.PRNGKey(0)
    kx, kw = jax.random.split(key)
    x = jax.random.normal(kx, (B, C_in, N), dtype=jnp.float32)
    scale = 1.0 / (C_in * C_out)
    weights = scale * jax.random.normal(kw, (C_in, C_out, modes1, 2),
                                        dtype=jnp.float32)

    y_ref = _reference(x, weights)

    # float32 path: tight tolerance against the FFT reference.
    y_f32 = jax.block_until_ready(
        spectral_conv1d(x, weights, dft_dtype=jnp.float32))
    np.testing.assert_allclose(np.asarray(y_f32), np.asarray(y_ref),
                               rtol=1e-4, atol=1e-4)

    # Default bfloat16 path (perf mode): looser tolerance.
    y_bf16 = jax.block_until_ready(spectral_conv1d(x, weights))
    np.testing.assert_allclose(np.asarray(y_bf16), np.asarray(y_ref),
                               rtol=5e-2, atol=5e-2)

    print("KERNEL_OK")
</pallas_src>

<mosaic_0001>
module attributes {stable_mosaic.version = 11 : i64} {
  func.func @_spectral_conv_kernel(%arg0: i32, %arg1: memref<8x16xf32, #tpu.memory_space<vmem>>, %arg2: memref<8x16xf32, #tpu.memory_space<vmem>>, %arg3: memref<8x16xf32, #tpu.memory_space<vmem>>, %arg4: memref<8x4x8xf32, #tpu.memory_space<vmem>>, %arg5: memref<8x4x8xf32, #tpu.memory_space<vmem>>, %arg6: memref<8x16xf32, #tpu.memory_space<vmem>>, %arg7: memref<8x16xf32, #tpu.memory_space<vmem>>, %arg8: memref<8x16xf32, #tpu.memory_space<vmem>>) attributes {dimension_semantics = [#tpu.dimension_semantics<parallel>], iteration_bounds = array<i64: 1>, scalar_prefetch = 0 : i64, scratch_operands = 0 : i64, tpu.core_type = #tpu.core_type<tc>, window_params = [{transform_indices = @transform_0, window_bounds = array<i64: 8, 16>}, {pipeline_mode = #tpu.pipeline_mode<synchronous>, transform_indices = @transform_1, window_bounds = array<i64: 8, 16>}, {pipeline_mode = #tpu.pipeline_mode<synchronous>, transform_indices = @transform_2, window_bounds = array<i64: 8, 16>}, {pipeline_mode = #tpu.pipeline_mode<synchronous>, transform_indices = @transform_3, window_bounds = array<i64: 8, 4, 8>}, {pipeline_mode = #tpu.pipeline_mode<synchronous>, transform_indices = @transform_4, window_bounds = array<i64: 8, 4, 8>}, {pipeline_mode = #tpu.pipeline_mode<synchronous>, transform_indices = @transform_5, window_bounds = array<i64: 8, 16>}, {pipeline_mode = #tpu.pipeline_mode<synchronous>, transform_indices = @transform_6, window_bounds = array<i64: 8, 16>}, {transform_indices = @transform_7, window_bounds = array<i64: 8, 16>}]} {
    %c0 = arith.constant 0 : index
    %c0_0 = arith.constant 0 : index
    %0 = vector.load %arg1[%c0, %c0_0] : memref<8x16xf32, #tpu.memory_space<vmem>>, vector<8x16xf32>
    %c0_1 = arith.constant 0 : index
    %c0_2 = arith.constant 0 : index
    %1 = vector.load %arg2[%c0_1, %c0_2] : memref<8x16xf32, #tpu.memory_space<vmem>>, vector<8x16xf32>
    %cst = arith.constant dense<0.000000e+00> : vector<8x8xf32>
    %2 = tpu.matmul %1, %0, %cst {dimension_numbers = #tpu.dot_dimension_numbers<[1], [1], [0], [0], [0, 0, 1, 0], [], []>} : vector<8x16xf32>, vector<8x16xf32>, vector<8x8xf32> -> vector<8x8xf32>
    %c0_3 = arith.constant 0 : index
    %c0_4 = arith.constant 0 : index
    %3 = vector.load %arg3[%c0_3, %c0_4] : memref<8x16xf32, #tpu.memory_space<vmem>>, vector<8x16xf32>
    %cst_5 = arith.constant dense<0.000000e+00> : vector<8x8xf32>
    %4 = tpu.matmul %3, %0, %cst_5 {dimension_numbers = #tpu.dot_dimension_numbers<[1], [1], [0], [0], [0, 0, 1, 0], [], []>} : vector<8x16xf32>, vector<8x16xf32>, vector<8x8xf32> -> vector<8x8xf32>
    %5 = vector.shape_cast %2 : vector<8x8xf32> to vector<8x2x4xf32>
    %6 = vector.shape_cast %4 : vector<8x8xf32> to vector<8x2x4xf32>
    %c0_6 = arith.constant 0 : index
    %c0_7 = arith.constant 0 : index
    %c0_8 = arith.constant 0 : index
    %7 = vector.load %arg4[%c0_6, %c0_7, %c0_8] : memref<8x4x8xf32, #tpu.memory_space<vmem>>, vector<8x4x8xf32>
    %cst_9 = arith.constant dense<0.000000e+00> : vector<8x2x8xf32>
    %8 = tpu.matmul %5, %7, %cst_9 {dimension_numbers = #tpu.dot_dimension_numbers<[2], [1], [1], [2], [0, 0, 0, 1, 1, 2], [0], [0]>} : vector<8x2x4xf32>, vector<8x4x8xf32>, vector<8x2x8xf32> -> vector<8x2x8xf32>
    %c0_10 = arith.constant 0 : index
    %c0_11 = arith.constant 0 : index
    %c0_12 = arith.constant 0 : index
    %9 = vector.load %arg5[%c0_10, %c0_11, %c0_12] : memref<8x4x8xf32, #tpu.memory_space<vmem>>, vector<8x4x8xf32>
    %cst_13 = arith.constant dense<0.000000e+00> : vector<8x2x8xf32>
    %10 = tpu.matmul %6, %9, %cst_13 {dimension_numbers = #tpu.dot_dimension_numbers<[2], [1], [1], [2], [0, 0, 0, 1, 1, 2], [0], [0]>} : vector<8x2x4xf32>, vector<8x4x8xf32>, vector<8x2x8xf32> -> vector<8x2x8xf32>
    %11 = arith.addf %8, %10 : vector<8x2x8xf32>
    %12 = vector.extract_strided_slice %11 {offsets = [0, 0, 0], sizes = [8, 2, 4], strides = [1, 1, 1]} : vector<8x2x8xf32> to vector<8x2x4xf32>
    %13 = vector.shape_cast %12 : vector<8x2x4xf32> to vector<8x8xf32>
    %14 = vector.extract_strided_slice %11 {offsets = [0, 0, 4], sizes = [8, 2, 4], strides = [1, 1, 1]} : vector<8x2x8xf32> to vector<8x2x4xf32>
    %15 = vector.shape_cast %14 : vector<8x2x4xf32> to vector<8x8xf32>
    %c0_14 = arith.constant 0 : index
    %c0_15 = arith.constant 0 : index
    %16 = vector.load %arg6[%c0_14, %c0_15] : memref<8x16xf32, #tpu.memory_space<vmem>>, vector<8x16xf32>
    %cst_16 = arith.constant dense<0.000000e+00> : vector<8x16xf32>
    %17 = tpu.matmul %13, %16, %cst_16 {dimension_numbers = #tpu.dot_dimension_numbers<[0], [0], [1], [1], [0, 1, 1, 1], [], []>} : vector<8x8xf32>, vector<8x16xf32>, vector<8x16xf32> -> vector<8x16xf32>
    %c0_17 = arith.constant 0 : index
    %c0_18 = arith.constant 0 : index
    %18 = vector.load %arg7[%c0_17, %c0_18] : memref<8x16xf32, #tpu.memory_space<vmem>>, vector<8x16xf32>
    %cst_19 = arith.constant dense<0.000000e+00> : vector<8x16xf32>
    %19 = tpu.matmul %15, %18, %cst_19 {dimension_numbers = #tpu.dot_dimension_numbers<[0], [0], [1], [1], [0, 1, 1, 1], [], []>} : vector<8x8xf32>, vector<8x16xf32>, vector<8x16xf32> -> vector<8x16xf32>
    %20 = arith.addf %17, %19 : vector<8x16xf32>
    %c0_20 = arith.constant 0 : index
    %c0_21 = arith.constant 0 : index
    %21 = vector.load %arg8[%c0_20, %c0_21] : memref<8x16xf32, #tpu.memory_space<vmem>>, vector<8x16xf32>
    tpu.vector_store %arg8[%c0_20, %c0_21], %20 {strides = array<i32>} : memref<8x16xf32, #tpu.memory_space<vmem>>, vector<8x16xf32>,
    return
  }
  func.func @transform_0(%arg0: i32) -> (i32, i32) {
    %c0_i32 = arith.constant 0 : i32
    %c0_i32_0 = arith.constant 0 : i32
    return %arg0, %c0_i32 : i32, i32
  }
  func.func @transform_1(%arg0: i32) -> (i32, i32) {
    %c0_i32 = arith.constant 0 : i32
    %c0_i32_0 = arith.constant 0 : i32
    %c0_i32_1 = arith.constant 0 : i32
    return %c0_i32, %c0_i32_0 : i32, i32
  }
  func.func @transform_2(%arg0: i32) -> (i32, i32) {
    %c0_i32 = arith.constant 0 : i32
    %c0_i32_0 = arith.constant 0 : i32
    %c0_i32_1 = arith.constant 0 : i32
    return %c0_i32, %c0_i32_0 : i32, i32
  }
  func.func @transform_3(%arg0: i32) -> (i32, i32, i32) {
    %c0_i32 = arith.constant 0 : i32
    %c0_i32_0 = arith.constant 0 : i32
    %c0_i32_1 = arith.constant 0 : i32
    %c0_i32_2 = arith.constant 0 : i32
    return %c0_i32, %c0_i32_0, %c0_i32_1 : i32, i32, i32
  }
  func.func @transform_4(%arg0: i32) -> (i32, i32, i32) {
    %c0_i32 = arith.constant 0 : i32
    %c0_i32_0 = arith.constant 0 : i32
    %c0_i32_1 = arith.constant 0 : i32
    %c0_i32_2 = arith.constant 0 : i32
    return %c0_i32, %c0_i32_0, %c0_i32_1 : i32, i32, i32
  }
  func.func @transform_5(%arg0: i32) -> (i32, i32) {
    %c0_i32 = arith.constant 0 : i32
    %c0_i32_0 = arith.constant 0 : i32
    %c0_i32_1 = arith.constant 0 : i32
    return %c0_i32, %c0_i32_0 : i32, i32
  }
  func.func @transform_6(%arg0: i32) -> (i32, i32) {
    %c0_i32 = arith.constant 0 : i32
    %c0_i32_0 = arith.constant 0 : i32
    %c0_i32_1 = arith.constant 0 : i32
    return %c0_i32, %c0_i32_0 : i32, i32
  }
  func.func @transform_7(%arg0: i32) -> (i32, i32) {
    %c0_i32 = arith.constant 0 : i32
    %c0_i32_0 = arith.constant 0 : i32
    return %arg0, %c0_i32 : i32, i32
  }
}

module attributes {stable_mosaic.version = 11 : i64} {
  func.func @_spectral_conv_kernel(%arg0: i32, %arg1: memref<8x16xf32, #tpu.memory_space<vmem>>, %arg2: memref<8x16xf32, #tpu.memory_space<vmem>>, %arg3: memref<8x16xf32, #tpu.memory_space<vmem>>, %arg4: memref<8x4x8xf32, #tpu.memory_space<vmem>>, %arg5: memref<8x4x8xf32, #tpu.memory_space<vmem>>, %arg6: memref<8x16xf32, #tpu.memory_space<vmem>>, %arg7: memref<8x16xf32, #tpu.memory_space<vmem>>, %arg8: memref<8x16xf32, #tpu.memory_space<vmem>>) attributes {dimension_semantics = [#tpu.dimension_semantics<parallel>], iteration_bounds = array<i64: 1>, scalar_prefetch = 0 : i64, scratch_operands = 0 : i64, tpu.core_type = #tpu.core_type<tc>, window_params = [{transform_indices = @transform_0, window_bounds = array<i64: 8, 16>}, {pipeline_mode = #tpu.pipeline_mode<synchronous>, transform_indices = @transform_1, window_bounds = array<i64: 8, 16>}, {pipeline_mode = #tpu.pipeline_mode<synchronous>, transform_indices = @transform_2, window_bounds = array<i64: 8, 16>}, {pipeline_mode = #tpu.pipeline_mode<synchronous>, transform_indices = @transform_3, window_bounds = array<i64: 8, 4, 8>}, {pipeline_mode = #tpu.pipeline_mode<synchronous>, transform_indices = @transform_4, window_bounds = array<i64: 8, 4, 8>}, {pipeline_mode = #tpu.pipeline_mode<synchronous>, transform_indices = @transform_5, window_bounds = array<i64: 8, 16>}, {pipeline_mode = #tpu.pipeline_mode<synchronous>, transform_indices = @transform_6, window_bounds = array<i64: 8, 16>}, {transform_indices = @transform_7, window_bounds = array<i64: 8, 16>}]} {
    %c0 = arith.constant 0 : index
    %c0_0 = arith.constant 0 : index
    %0 = vector.load %arg1[%c0, %c0_0] : memref<8x16xf32, #tpu.memory_space<vmem>>, vector<8x16xf32>
    %c0_1 = arith.constant 0 : index
    %c0_2 = arith.constant 0 : index
    %1 = vector.load %arg2[%c0_1, %c0_2] : memref<8x16xf32, #tpu.memory_space<vmem>>, vector<8x16xf32>
    %cst = arith.constant dense<0.000000e+00> : vector<8x8xf32>
    %2 = tpu.matmul %1, %0, %cst {dimension_numbers = #tpu.dot_dimension_numbers<[1], [1], [0], [0], [0, 0, 1, 0], [], []>} : vector<8x16xf32>, vector<8x16xf32>, vector<8x8xf32> -> vector<8x8xf32>
    %c0_3 = arith.constant 0 : index
    %c0_4 = arith.constant 0 : index
    %3 = vector.load %arg3[%c0_3, %c0_4] : memref<8x16xf32, #tpu.memory_space<vmem>>, vector<8x16xf32>
    %cst_5 = arith.constant dense<0.000000e+00> : vector<8x8xf32>
    %4 = tpu.matmul %3, %0, %cst_5 {dimension_numbers = #tpu.dot_dimension_numbers<[1], [1], [0], [0], [0, 0, 1, 0], [], []>} : vector<8x16xf32>, vector<8x16xf32>, vector<8x8xf32> -> vector<8x8xf32>
    %5 = vector.shape_cast %2 : vector<8x8xf32> to vector<8x2x4xf32>
    %6 = vector.shape_cast %4 : vector<8x8xf32> to vector<8x2x4xf32>
    %c0_6 = arith.constant 0 : index
    %c0_7 = arith.constant 0 : index
    %c0_8 = arith.constant 0 : index
    %7 = vector.load %arg4[%c0_6, %c0_7, %c0_8] : memref<8x4x8xf32, #tpu.memory_space<vmem>>, vector<8x4x8xf32>
    %cst_9 = arith.constant dense<0.000000e+00> : vector<8x2x8xf32>
    %8 = tpu.matmul %5, %7, %cst_9 {dimension_numbers = #tpu.dot_dimension_numbers<[2], [1], [1], [2], [0, 0, 0, 1, 1, 2], [0], [0]>} : vector<8x2x4xf32>, vector<8x4x8xf32>, vector<8x2x8xf32> -> vector<8x2x8xf32>
    %c0_10 = arith.constant 0 : index
    %c0_11 = arith.constant 0 : index
    %c0_12 = arith.constant 0 : index
    %9 = vector.load %arg5[%c0_10, %c0_11, %c0_12] : memref<8x4x8xf32, #tpu.memory_space<vmem>>, vector<8x4x8xf32>
    %cst_13 = arith.constant dense<0.000000e+00> : vector<8x2x8xf32>
    %10 = tpu.matmul %6, %9, %cst_13 {dimension_numbers = #tpu.dot_dimension_numbers<[2], [1], [1], [2], [0, 0, 0, 1, 1, 2], [0], [0]>} : vector<8x2x4xf32>, vector<8x4x8xf32>, vector<8x2x8xf32> -> vector<8x2x8xf32>
    %11 = arith.addf %8, %10 : vector<8x2x8xf32>
    %12 = vector.extract_strided_slice %11 {offsets = [0, 0, 0], sizes = [8, 2, 4], strides = [1, 1, 1]} : vector<8x2x8xf32> to vector<8x2x4xf32>
    %13 = vector.shape_cast %12 : vector<8x2x4xf32> to vector<8x8xf32>
    %14 = vector.extract_strided_slice %11 {offsets = [0, 0, 4], sizes = [8, 2, 4], strides = [1, 1, 1]} : vector<8x2x8xf32> to vector<8x2x4xf32>
    %15 = vector.shape_cast %14 : vector<8x2x4xf32> to vector<8x8xf32>
    %c0_14 = arith.constant 0 : index
    %c0_15 = arith.constant 0 : index
    %16 = vector.load %arg6[%c0_14, %c0_15] : memref<8x16xf32, #tpu.memory_space<vmem>>, vector<8x16xf32>
    %cst_16 = arith.constant dense<0.000000e+00> : vector<8x16xf32>
    %17 = tpu.matmul %13, %16, %cst_16 {dimension_numbers = #tpu.dot_dimension_numbers<[0], [0], [1], [1], [0, 1, 1, 1], [], []>} : vector<8x8xf32>, vector<8x16xf32>, vector<8x16xf32> -> vector<8x16xf32>
    %c0_17 = arith.constant 0 : index
    %c0_18 = arith.constant 0 : index
    %18 = vector.load %arg7[%c0_17, %c0_18] : memref<8x16xf32, #tpu.memory_space<vmem>>, vector<8x16xf32>
    %cst_19 = arith.constant dense<0.000000e+00> : vector<8x16xf32>
    %19 = tpu.matmul %15, %18, %cst_19 {dimension_numbers = #tpu.dot_dimension_numbers<[0], [0], [1], [1], [0, 1, 1, 1], [], []>} : vector<8x8xf32>, vector<8x16xf32>, vector<8x16xf32> -> vector<8x16xf32>
    %20 = arith.addf %17, %19 : vector<8x16xf32>
    %c0_20 = arith.constant 0 : index
    %c0_21 = arith.constant 0 : index
    %21 = vector.load %arg8[%c0_20, %c0_21] : memref<8x16xf32, #tpu.memory_space<vmem>>, vector<8x16xf32>
    tpu.vector_store %arg8[%c0_20, %c0_21], %20 {strides = array<i32>} : memref<8x16xf32, #tpu.memory_space<vmem>>, vector<8x16xf32>,
    return
  }
  func.func @transform_0(%arg0: i32) -> (i32, i32) {
    %c0_i32 = arith.constant 0 : i32
    %c0_i32_0 = arith.constant 0 : i32
    return %arg0, %c0_i32 : i32, i32
  }
  func.func @transform_1(%arg0: i32) -> (i32, i32) {
    %c0_i32 = arith.constant 0 : i32
    %c0_i32_0 = arith.constant 0 : i32
    %c0_i32_1 = arith.constant 0 : i32
    return %c0_i32, %c0_i32_0 : i32, i32
  }
  func.func @transform_2(%arg0: i32) -> (i32, i32) {
    %c0_i32 = arith.constant 0 : i32
    %c0_i32_0 = arith.constant 0 : i32
    %c0_i32_1 = arith.constant 0 : i32
    return %c0_i32, %c0_i32_0 : i32, i32
  }
  func.func @transform_3(%arg0: i32) -> (i32, i32, i32) {
    %c0_i32 = arith.constant 0 : i32
    %c0_i32_0 = arith.constant 0 : i32
    %c0_i32_1 = arith.constant 0 : i32
    %c0_i32_2 = arith.constant 0 : i32
    return %c0_i32, %c0_i32_0, %c0_i32_1 : i32, i32, i32
  }
  func.func @transform_4(%arg0: i32) -> (i32, i32, i32) {
    %c0_i32 = arith.constant 0 : i32
    %c0_i32_0 = arith.constant 0 : i32
    %c0_i32_1 = arith.constant 0 : i32
    %c0_i32_2 = arith.constant 0 : i32
    return %c0_i32, %c0_i32_0, %c0_i32_1 : i32, i32, i32
  }
  func.func @transform_5(%arg0: i32) -> (i32, i32) {
    %c0_i32 = arith.constant 0 : i32
    %c0_i32_0 = arith.constant 0 : i32
    %c0_i32_1 = arith.constant 0 : i32
    return %c0_i32, %c0_i32_0 : i32, i32
  }
  func.func @transform_6(%arg0: i32) -> (i32, i32) {
    %c0_i32 = arith.constant 0 : i32
    %c0_i32_0 = arith.constant 0 : i32
    %c0_i32_1 = arith.constant 0 : i32
    return %c0_i32, %c0_i32_0 : i32, i32
  }
  func.func @transform_7(%arg0: i32) -> (i32, i32) {
    %c0_i32 = arith.constant 0 : i32
    %c0_i32_0 = arith.constant 0 : i32
    return %arg0, %c0_i32 : i32, i32
  }
}

</mosaic_0001>

<bundles_post_ra>
// kernel: tpu_custom_call.1
= control target key start
LH: loop header
LB: loop body
LE: loop exit
PB: predicated region body
PF: predicated region fallthrough
CT: control target
= control target key end

     0   :  { %12 = vsyncpa [#allocation3], 0  ;;  %s2588_s0 = inlined_call_operand.hbm [shape: f32[8,16], index: 0, kind: input, shape index: {}]   ;;  %s2589_s1 = inlined_call_operand.hbm [shape: f32[8,16], index: 1, kind: input, shape index: {}]   ;;  %s2590_s2 = inlined_call_operand.hbm [shape: f32[8,16], index: 2, kind: input, shape index: {}]   ;;  %s2591_s3 = inlined_call_operand.hbm [shape: f32[8,4,8], index: 3, kind: input, shape index: {}]   ;;  %s2592_s4 = inlined_call_operand.hbm [shape: f32[8,4,8], index: 4, kind: input, shape index: {}]   ;;  %s2593_s5 = inlined_call_operand.vmem [shape: f32[8,16], index: 5, kind: input, shape index: {}]   ;;  %s2594_s6 = inlined_call_operand.hbm [shape: f32[8,16], index: 6, kind: input, shape index: {}]   ;;  %s2595_s7 = inlined_call_operand.hbm [shape: f32[8,16], index: 7, kind: output, shape index: {}]  }
   0x1   :  { %13 = vsyncpa [#allocation6], 0 }
   0x2   :  { %14 = vsyncpa [#allocation9], 0 }
   0x3   :  { %15 = vsyncpa [#allocation12], 0 }
   0x4   :  { %16 = vsyncpa [#allocation4], 0  ;;  %s2344_s24 = smov [#allocation5]   ;;  %s2345_s26 = smov [#allocation8]  }
   0x5   :  { %s33_s25 = sshll.u32 %s2344_s24, 4  ;;  %s52_s27 = sshll.u32 %s2345_s26, 4  ;;  %s34_s25 = int_to_ptr.vmem [resolvable:$true] %s33_s25  ;;  %s53_s27 = int_to_ptr.vmem [resolvable:$true] %s52_s27 }
   0x6   :  { %s2202_s28 = scalar_lea.vmem %s34_s25, 128  ;;  %p2207_p1 = scmp.lt.s32.totalorder %s34_s25, %s34_s25 }
   0x7   :  { %p2203_p0 = scmp.ne.s32.totalorder %s34_s25, %s2202_s28  ;;  %p2208_p2 = scmp.lt.s32.totalorder %s2202_s28, %s2202_s28 }
   0x9   :  { %p2209_p3 = por %p2208_p2, %p2207_p1 }
   0xb   :  { %p2210_p4 = pnand %p2209_p3, %p2203_p0 }
   0xd   :  { %2213 = shalt.err (!%p2210_p4)
}
   0xe   :  { %36 = dma.hbm_to_vmem [thread:$0]  %s2589_s1, 128, %s34_s25, [#allocation6]  }
   0xf   :  { %s2222_s8 = scalar_lea.vmem %s53_s27, 512  ;;  %p2227_p6 = scmp.lt.s32.totalorder %s53_s27, %s53_s27 }
  0x10   :  { %p2223_p5 = scmp.ne.s32.totalorder %s53_s27, %s2222_s8  ;;  %p2228_p7 = scmp.lt.s32.totalorder %s2222_s8, %s2222_s8 }
  0x12   :  { %p2229_p8 = por %p2228_p7, %p2227_p6 }
  0x14   :  { %p2230_p9 = pnand %p2229_p8, %p2223_p5 }
  0x16   :  { %2233 = shalt.err (!%p2230_p9)
}
  0x17   :  { %s2346_s9 = smov 64   ;;  %s2347_s10 = smov 4  }
  0x18   :  { %58 = dma.hbm_to_vmem [thread:$0]  %s2591_s3, 512, %s53_s27, [#allocation9], %s2346_s9, %s2346_s9, %s2347_s10  }
  0x19   :  { %s2348_s13 = smov [#allocation2]   ;;  %s2349_s15 = smov [#allocation7]  }
  0x1a   :  { %s23_s14 = sshll.u32 %s2348_s13, 4  ;;  %s43_s1 = sshll.u32 %s2349_s15, 4  ;;  %s24_s14 = int_to_ptr.vmem [resolvable:$true] %s23_s14  ;;  %s44_s1 = int_to_ptr.vmem [resolvable:$true] %s43_s1 }
  0x1b   :  { %s2242_s16 = scalar_lea.vmem %s24_s14, 128  ;;  %p2247_p11 = scmp.lt.s32.totalorder %s24_s14, %s24_s14 }
  0x1c   :  { %p2243_p10 = scmp.ne.s32.totalorder %s24_s14, %s2242_s16  ;;  %p2248_p12 = scmp.lt.s32.totalorder %s2242_s16, %s2242_s16 }
  0x1e   :  { %p2249_p13 = por %p2248_p12, %p2247_p11 }
  0x20   :  { %p2250_p0 = pnand %p2249_p13, %p2243_p10 }
  0x22   :  { %2253 = shalt.err (!%p2250_p0)
}
  0x23   :  { %26 = dma.hbm_to_vmem [thread:$0]  %s2588_s0, 128, %s24_s14, [#allocation3]  }
  0x24   :  { %s2262_s19 = scalar_lea.vmem %s44_s1, 128  ;;  %p2267_p2 = scmp.lt.s32.totalorder %s44_s1, %s44_s1 }
  0x25   :  { %p2263_p1 = scmp.ne.s32.totalorder %s44_s1, %s2262_s19  ;;  %p2268_p3 = scmp.lt.s32.totalorder %s2262_s19, %s2262_s19 }
  0x27   :  { %p2269_p4 = por %p2268_p3, %p2267_p2 }
  0x29   :  { %p2270_p5 = pnand %p2269_p4, %p2263_p1 }
  0x2b   :  { %2273 = shalt.err (!%p2270_p5)
}
  0x2c   :  { %46 = dma.hbm_to_vmem [thread:$0]  %s2590_s2, 128, %s44_s1, [#allocation6]  }
  0x2d   :  { %s2350_s21 = smov [#allocation10]   ;;  %s2351_s23 = smov [#allocation11]  }
  0x2e   :  { %s64_s22 = sshll.u32 %s2350_s21, 4  ;;  %s79_s24 = sshll.u32 %s2351_s23, 4  ;;  %s65_s22 = int_to_ptr.vmem [resolvable:$true] %s64_s22  ;;  %s80_s24 = int_to_ptr.vmem [resolvable:$true] %s79_s24 }
  0x2f   :  { %s2282_s25 = scalar_lea.vmem %s65_s22, 512  ;;  %p2287_p7 = scmp.lt.s32.totalorder %s65_s22, %s65_s22 }
  0x30   :  { %p2283_p6 = scmp.ne.s32.totalorder %s65_s22, %s2282_s25  ;;  %p2288_p8 = scmp.lt.s32.totalorder %s2282_s25, %s2282_s25 }
  0x32   :  { %p2289_p9 = por %p2288_p8, %p2287_p7 }
  0x34   :  { %p2290_p10 = pnand %p2289_p9, %p2283_p6 }
  0x36   :  { %2293 = shalt.err (!%p2290_p10)
}
  0x37   :  { %70 = dma.hbm_to_vmem [thread:$0]  %s2592_s4, 512, %s65_s22, [#allocation9], %s2346_s9, %s2346_s9, %s2347_s10  }
  0x38   :  { %s2302_s2 = scalar_lea.vmem %s80_s24, 128  ;;  %p2307_p12 = scmp.lt.s32.totalorder %s80_s24, %s80_s24 }
  0x39   :  { %p2303_p11 = scmp.ne.s32.totalorder %s80_s24, %s2302_s2  ;;  %p2308_p13 = scmp.lt.s32.totalorder %s2302_s2, %s2302_s2 }
  0x3b   :  { %p2309_p0 = por %p2308_p13, %p2307_p12 }
  0x3d   :  { %p2310_p1 = pnand %p2309_p0, %p2303_p11 }
  0x3f   :  { %2313 = shalt.err (!%p2310_p1)
}
  0x40   :  { %82 = dma.hbm_to_vmem [thread:$0]  %s2594_s6, 128, %s80_s24, [#allocation12]  }
  0x41   :  { %2334 = dma.done.wait [#allocation3], 128  }
  0x42   :  { %2335 = vsyncadd [#allocation3], 4294967168 }
  0x43   :  { %2336 = dma.done.wait [#allocation6], 256  }
  0x44   :  { %2337 = vsyncadd [#allocation6], 4294967040 }
  0x45   :  { %2338 = dma.done.wait [#allocation9], 1024  }
  0x46   :  { %2339 = vsyncadd [#allocation9], 4294966272 }
  0x47   :  { %2340 = dma.done.wait [#allocation12], 128  }
  0x48   :  { %2341 = vsyncadd [#allocation12], 4294967168  ;;  %v2352_v0 = vmov 0.0   ;;  %vm2353_vm0 = vmmov 0   ;;  %vm103_vm1 = vcmask 130048   ;;  %v101_v1 = vld [vmem:[#allocation2] sm:$0xff]  ;;  %v262_v12 = vlaneseq }
  0x49   :  { %2085 = vmatprep.subr.mxu1 %v2352_v0  ;;  %2087 = vmatprep.mubr.msk.f32.mxu1 %vm2353_vm0, %v2352_v0  ;;  %v180_v2 = vld [vmem:[#allocation7] sm:$0xff]  ;;  %v102_v3 = vld [vmem:[#allocation5] sm:$0xff]  ;;  %v402_v4 = vld [vmem:[#allocation10] sm:$0xf]  ;;  %vm414_vm2 = vcmask 1043456   ;;  %s2354_s4 = smov 124  }
  0x4a   :  { %2080 = vmatprep.subr.mxu0 %v2352_v0  ;;  %2082 = vmatprep.mubr.msk.f32.mxu0 %vm2353_vm0, %v2352_v0  ;;  %v403_v5 = vld [vmem:[#allocation10 + $0x4] sm:$0xf]  ;;  %v2355_v10 = vmov 1983009808   ;;  %v2356_v13 = vmov 1934713408  }
  0x4b   :  { %2086 = vmatpush3.xpose.msk.msra.mxu1 %vm103_vm1, %v101_v1  ;;  %2081 = vmatpush3.xpose.msk.msra.mxu0 %vm103_vm1, %v101_v1  ;;  %v260_v11 = vunpack.c.l.s4 %v2355_v10  ;;  %v291_v14 = vunpack.c.l.s4 %v2356_v13  ;;  %v263_v16 = vshrl.u32 %v262_v12, 7  ;;  %vm410_vm3 = vcmask 31744   ;;  %v404_v30 = vld [vmem:[#allocation10 + $0x8] sm:$0xf]  ;;  %v405_v34 = vld [vmem:[#allocation10 + $0xc] sm:$0xf] }
  0x4c   :  { %2090 = vmatprep.subr.mxu0 %v2352_v0  ;;  %2095 = vmatprep.subr.mxu1 %v2352_v0  ;;  %v406_v36 = vld [vmem:[#allocation10 + $0x10] sm:$0xf]  ;;  %v407_v41 = vld [vmem:[#allocation10 + $0x14] sm:$0xf]  ;;  %v408_v43 = vld [vmem:[#allocation10 + $0x18] sm:$0xf] }
  0x4d   :  { %v261_v15 = vunpack.c.0.s8 %v260_v11  ;;  %v292_v17 = vunpack.c.0.s8 %v291_v14  ;;  %v409_v48 = vld [vmem:[#allocation10 + $0x1c] sm:$0xf]  ;;  %v394_v50 = vld [vmem:[#allocation8] sm:$0xf]  ;;  %v395_v55 = vld [vmem:[#allocation8 + $0x4] sm:$0xf] }
  0x4e   :  { %2088 = vmatmul.mubr.msk.f32.vlgmr.msra.gmra.mxu1 %vm103_vm1, %v180_v2  ;;  %2083 = vmatmul.mubr.msk.f32.vlgmr.msra.gmra.mxu0 %vm103_vm1, %v102_v3  ;;  %v396_v57 = vld [vmem:[#allocation8 + $0x8] sm:$0xf]  ;;  %v397_v61 = vld [vmem:[#allocation8 + $0xc] sm:$0xf]  ;;  %v398_v62 = vld [vmem:[#allocation8 + $0x10] sm:$0xf] }
  0x4f   :  { %2092 = vmatprep.mubr.msk.f32.mxu0 %vm2353_vm0, %v2352_v0  ;;  %2097 = vmatprep.mubr.msk.f32.mxu1 %vm2353_vm0, %v2352_v0  ;;  %v2447_v18 = vsub.s32 %v261_v15, %v263_v16  ;;  %v2449_v19 = vsub.s32 %v292_v17, %v263_v16  ;;  %v399_v3 = vld [vmem:[#allocation8 + $0x14] sm:$0xf]  ;;  %vm1804_vm4 = vcmask 64512  }
  0x50   :  { %2091 = vmatpush3.msk.msra.mxu0 %vm414_vm2, %v402_v4  ;;  %2096 = vmatpush3.msk.msra.mxu1 %vm414_vm2, %v403_v5  ;;  %v400_v4 = vld [vmem:[#allocation8 + $0x18] sm:$0xf] }
  0x51   :  { %2100 = vmatprep.subr.mxu0 %v2352_v0  ;;  %2105 = vmatprep.subr.mxu1 %v2352_v0 }
 0x10e   :  { %v250_v6 = vpop.f32.mrf.mxu1  ;;  %v2442_v7 = vpop.f32.mrf.mxu0 }
 0x10f   :  { %325 = vrot.lane.b32.xlu0 %v250_v6, %s2354_s4  ;;  %v328_v21 = vcombine.high %v250_v6, %v2352_v0  ;;  %v335_v22 = vrot.slane %v250_v6, %v2447_v18  ;;  %v265_v42 = vrot.slane %v2442_v7, %v2447_v18  ;;  %v258_v49 = vcombine.high %v2442_v7, %v2352_v0 }
 0x110   :  { %v2089_v8 = vpop.f32.mrf.mxu1  ;;  %v2084_v9 = vpop.f32.mrf.mxu0 }
 0x111   :  { %v342_v28 = vrot.slane %v328_v21, %v2447_v18  ;;  %v272_v56 = vrot.slane %v258_v49, %v2447_v18 }
 0x113   :  { %255 = vrot.lane.b32.xlu0 %v2442_v7, %s2354_s4  ;;  %v401_v7 = vld [vmem:[#allocation8 + $0x1c] sm:$0xf] }
 0x181   :  { %v326_v20 = vpop.permute.xlu0 %325 }
 0x182   :  { %v343_v23 = vcombine.high %v326_v20, %v2352_v0  ;;  %v350_v24 = vrot.slane %v326_v20, %v2447_v18 }
 0x184   :  { %v357_v25 = vrot.slane %v343_v23, %v2447_v18  ;;  %v358_v26 = vcombine.low %v335_v22, %v350_v24  ;;  %v359_v27 = vcombine.high %v335_v22, %v350_v24 }
 0x185   :  { %v256_v35 = vpop.permute.xlu0 %255 }
 0x186   :  { %v366_v29 = vrot.slane %v358_v26, %v2449_v19  ;;  %v373_v31 = vrot.slane %v359_v27, %v2449_v19  ;;  %v374_v32 = vcombine.low %v342_v28, %v357_v25  ;;  %v375_v37 = vcombine.high %v342_v28, %v357_v25 }
 0x187   :  { %v280_v40 = vrot.slane %v256_v35, %v2447_v18  ;;  %v273_v44 = vcombine.high %v256_v35, %v2352_v0 }
 0x188   :  { %v390_v33 = vcombine.high %v366_v29, %v2352_v0  ;;  %2093 = vmatmul.mubr.msk.f32.vlgmr.msra.gmra.mxu0 %vm410_vm3, %v366_v29  ;;  %v382_v38 = vrot.slane %v374_v32, %v2449_v19  ;;  %v391_v39 = vcombine.high %v373_v31, %v2352_v0  ;;  %v389_v45 = vrot.slane %v375_v37, %v2449_v19 }
 0x189   :  { %2101 = vmatpush3.msk.msra.mxu0 %vm414_vm2, %v404_v30  ;;  %2102 = vmatprep.mubr.msk.f32.mxu0 %vm2353_vm0, %v2352_v0  ;;  %v288_v47 = vcombine.low %v265_v42, %v280_v40  ;;  %v287_v51 = vrot.slane %v273_v44, %v2447_v18  ;;  %v289_v53 = vcombine.high %v265_v42, %v280_v40 }
 0x18a   :  { %2098 = vmatmul.mubr.msk.f32.vlgmr.msra.gmra.mxu1 %vm410_vm3, %v390_v33  ;;  %2110 = vmatprep.subr.mxu0 %v2352_v0  ;;  %v392_v46 = vcombine.high %v382_v38, %v2352_v0  ;;  %v393_v52 = vcombine.high %v389_v45, %v2352_v0 }
 0x18b   :  { %2106 = vmatpush3.msk.msra.mxu1 %vm414_vm2, %v405_v34  ;;  %2107 = vmatprep.mubr.msk.f32.mxu1 %vm2353_vm0, %v2352_v0  ;;  %v296_v54 = vrot.slane %v288_v47, %v2449_v19  ;;  %v303_v58 = vrot.slane %v289_v53, %v2449_v19  ;;  %v304_v59 = vcombine.low %v272_v56, %v287_v51 }
 0x18c   :  { %2103 = vmatmul.mubr.msk.f32.vlgmr.msra.gmra.mxu0 %vm410_vm3, %v373_v31  ;;  %2115 = vmatprep.subr.mxu1 %v2352_v0  ;;  %v305_v63 = vcombine.high %v272_v56, %v287_v51 }
 0x18d   :  { %2111 = vmatpush3.msk.msra.mxu0 %vm414_vm2, %v406_v36  ;;  %2112 = vmatprep.mubr.msk.f32.mxu0 %vm2353_vm0, %v2352_v0  ;;  %v320_v60 = vcombine.high %v296_v54, %v2352_v0  ;;  %v312_v1 = vrot.slane %v304_v59, %v2449_v19  ;;  %v321_v2 = vcombine.high %v303_v58, %v2352_v0 }
 0x18e   :  { %2108 = vmatmul.mubr.msk.f32.vlgmr.msra.gmra.mxu1 %vm410_vm3, %v391_v39  ;;  %2120 = vmatprep.subr.mxu0 %v2352_v0  ;;  %v319_v5 = vrot.slane %v305_v63, %v2449_v19 }
 0x18f   :  { %2116 = vmatpush3.msk.msra.mxu1 %vm414_vm2, %v407_v41  ;;  %2117 = vmatprep.mubr.msk.f32.mxu1 %vm2353_vm0, %v2352_v0  ;;  %v322_v6 = vcombine.high %v312_v1, %v2352_v0 }
 0x190   :  { %2113 = vmatmul.mubr.msk.f32.vlgmr.msra.gmra.mxu0 %vm410_vm3, %v382_v38  ;;  %2125 = vmatprep.subr.mxu1 %v2352_v0  ;;  %v323_v8 = vcombine.high %v319_v5, %v2352_v0 }
 0x191   :  { %2121 = vmatpush3.msk.msra.mxu0 %vm414_vm2, %v408_v43  ;;  %2122 = vmatprep.mubr.msk.f32.mxu0 %vm2353_vm0, %v2352_v0 }
 0x192   :  { %2118 = vmatmul.mubr.msk.f32.vlgmr.msra.gmra.mxu1 %vm410_vm3, %v392_v46  ;;  %2130 = vmatprep.subr.mxu0 %v2352_v0 }
 0x193   :  { %2126 = vmatpush3.msk.msra.mxu1 %vm414_vm2, %v409_v48  ;;  %2127 = vmatprep.mubr.msk.f32.mxu1 %vm2353_vm0, %v2352_v0 }
 0x194   :  { %2123 = vmatmul.mubr.msk.f32.vlgmr.msra.gmra.mxu0 %vm410_vm3, %v389_v45  ;;  %2135 = vmatprep.subr.mxu1 %v2352_v0 }
 0x195   :  { %2131 = vmatpush3.msk.msra.mxu0 %vm414_vm2, %v394_v50  ;;  %2132 = vmatprep.mubr.msk.f32.mxu0 %vm2353_vm0, %v2352_v0 }
 0x196   :  { %2128 = vmatmul.mubr.msk.f32.vlgmr.msra.gmra.mxu1 %vm410_vm3, %v393_v52  ;;  %2140 = vmatprep.subr.mxu0 %v2352_v0 }
 0x197   :  { %2137 = vmatprep.mubr.msk.f32.mxu1 %vm2353_vm0, %v2352_v0  ;;  %2136 = vmatpush3.msk.msra.mxu1 %vm414_vm2, %v395_v55 }
 0x198   :  { %2133 = vmatmul.mubr.msk.f32.vlgmr.msra.gmra.mxu0 %vm410_vm3, %v296_v54  ;;  %2145 = vmatprep.subr.mxu1 %v2352_v0 }
 0x199   :  { %2142 = vmatprep.mubr.msk.f32.mxu0 %vm2353_vm0, %v2352_v0  ;;  %2141 = vmatpush3.msk.msra.mxu0 %vm414_vm2, %v396_v57 }
 0x19a   :  { %2138 = vmatmul.mubr.msk.f32.vlgmr.msra.gmra.mxu1 %vm410_vm3, %v320_v60  ;;  %2150 = vmatprep.subr.mxu0 %v2352_v0 }
 0x19b   :  { %2147 = vmatprep.mubr.msk.f32.mxu1 %vm2353_vm0, %v2352_v0  ;;  %2146 = vmatpush3.msk.msra.mxu1 %vm414_vm2, %v397_v61 }
 0x19c   :  { %2143 = vmatmul.mubr.msk.f32.vlgmr.msra.gmra.mxu0 %vm410_vm3, %v303_v58  ;;  %2155 = vmatprep.subr.mxu1 %v2352_v0 }
 0x19d   :  { %2152 = vmatprep.mubr.msk.f32.mxu0 %vm2353_vm0, %v2352_v0  ;;  %2151 = vmatpush3.msk.msra.mxu0 %vm414_vm2, %v398_v62 }
 0x19e   :  { %2148 = vmatmul.mubr.msk.f32.vlgmr.msra.gmra.mxu1 %vm410_vm3, %v321_v2  ;;  %2160 = vmatprep.subr.mxu0 %v2352_v0 }
 0x19f   :  { %2157 = vmatprep.mubr.msk.f32.mxu1 %vm2353_vm0, %v2352_v0  ;;  %2156 = vmatpush3.msk.msra.mxu1 %vm414_vm2, %v399_v3 }
 0x1a0   :  { %2153 = vmatmul.mubr.msk.f32.vlgmr.msra.gmra.mxu0 %vm410_vm3, %v312_v1  ;;  %2165 = vmatprep.subr.mxu1 %v2352_v0 }
 0x1a1   :  { %2162 = vmatprep.mubr.msk.f32.mxu0 %vm2353_vm0, %v2352_v0  ;;  %2161 = vmatpush3.msk.msra.mxu0 %vm414_vm2, %v400_v4 }
 0x1a2   :  { %2158 = vmatmul.mubr.msk.f32.vlgmr.msra.gmra.mxu1 %vm410_vm3, %v322_v6  ;;  %2170 = vmatprep.subr.mxu0 %v2352_v0 }
 0x1a3   :  { %2167 = vmatprep.mubr.msk.f32.mxu1 %vm2353_vm0, %v2352_v0  ;;  %2166 = vmatpush3.msk.msra.mxu1 %vm414_vm2, %v401_v7 }
 0x1a4   :  { %2163 = vmatmul.mubr.msk.f32.vlgmr.msra.gmra.mxu0 %vm410_vm3, %v319_v5  ;;  %2175 = vmatprep.subr.mxu1 %v2352_v0 }
 0x1a5   :  { %2172 = vmatprep.mubr.msk.f32.mxu0 %vm2353_vm0, %v2352_v0 }
 0x1a6   :  { %2168 = vmatmul.mubr.msk.f32.vlgmr.msra.gmra.mxu1 %vm410_vm3, %v323_v8 }
 0x1a7   :  { %2177 = vmatprep.mubr.msk.f32.mxu1 %vm2353_vm0, %v2352_v0 }
 0x248   :  { %v484_v9 = vpop.f32.mrf.mxu0 }
 0x24a   :  { %v2094_v10 = vpop.f32.mrf.mxu0  ;;  %v560_v11 = vpop.f32.mrf.mxu1 }
 0x24c   :  { %v2099_v12 = vpop.f32.mrf.mxu1  ;;  %v636_v13 = vpop.f32.mrf.mxu0 }
 0x24d   :  { %v1771_v12 = vld [vmem:[#allocation11] sm:$0xff] }
 0x24e   :  { %v2104_v14 = vpop.f32.mrf.mxu0  ;;  %v712_v15 = vpop.f32.mrf.mxu1  ;;  %2171 = vmatpush3.msra.mxu0 %v1771_v12 }
 0x250   :  { %v2109_v16 = vpop.f32.mrf.mxu1  ;;  %v788_v17 = vpop.f32.mrf.mxu0 }
 0x252   :  { %v2114_v20 = vpop.f32.mrf.mxu0  ;;  %v864_v21 = vpop.f32.mrf.mxu1 }
 0x254   :  { %v2119_v22 = vpop.f32.mrf.mxu1  ;;  %v940_v23 = vpop.f32.mrf.mxu0 }
 0x256   :  { %v2124_v24 = vpop.f32.mrf.mxu0  ;;  %v1016_v25 = vpop.f32.mrf.mxu1 }
 0x258   :  { %v2129_v26 = vpop.f32.mrf.mxu1  ;;  %v1092_v27 = vpop.f32.mrf.mxu0 }
 0x259   :  { %v1093_v28 = vadd.f32 %v1092_v27, %v484_v9 }
 0x25a   :  { %v2134_v29 = vpop.f32.mrf.mxu0  ;;  %v1168_v0 = vpop.f32.mrf.mxu1 }
 0x25b   :  { %1691 = vrot.lane.b32.xlu1 %v1093_v28, %s2354_s4  ;;  %v1169_v32 = vadd.f32 %v1168_v0, %v560_v11 }
 0x25c   :  { %v2139_v30 = vpop.f32.mrf.mxu1  ;;  %v1244_v31 = vpop.f32.mrf.mxu0 }
 0x25d   :  { %v1245_v33 = vadd.f32 %v1244_v31, %v636_v13  ;;  %v1770_v13 = vld [vmem:[%s2593_s5] sm:$0xff]  ;;  %s2357_s5 = smov [#allocation13]  }
 0x25e   :  { %v2144_v34 = vpop.f32.mrf.mxu0  ;;  %v1320_v35 = vpop.f32.mrf.mxu1  ;;  %2176 = vmatpush3.msra.mxu1 %v1770_v13  ;;  %s1990_s30 = sshll.u32 %s2357_s5, 4  ;;  %s1991_s30 = int_to_ptr.vmem [resolvable:$true] %s1990_s30 }
 0x25f   :  { %v1321_v36 = vadd.f32 %v1320_v35, %v712_v15  ;;  %1693 = vrot.lane.b32.xlu1 %v1169_v32, %s2354_s4  ;;  %1695 = vrot.lane.b32.xlu0 %v1245_v33, %s2354_s4  ;;  %v1628_v45 = vcombine.low %v1093_v28, %v1245_v33  ;;  %s2314_s8 = scalar_lea.vmem %s1991_s30, 128  ;;  %p2319_p3 = scmp.lt.s32.totalorder %s1991_s30, %s1991_s30 }
 0x260   :  { %v2149_v37 = vpop.f32.mrf.mxu1  ;;  %v1396_v38 = vpop.f32.mrf.mxu0  ;;  %p2315_p2 = scmp.ne.s32.totalorder %s1991_s30, %s2314_s8  ;;  %p2320_p4 = scmp.lt.s32.totalorder %s2314_s8, %s2314_s8 }
 0x261   :  { %v1397_v39 = vadd.f32 %v1396_v38, %v788_v17  ;;  %v1636_v42 = vcombine.low %v1169_v32, %v1321_v36  ;;  %v1635_v54 = vrot.slane %v1628_v45, %v2447_v18 }
 0x262   :  { %v2154_v40 = vpop.f32.mrf.mxu0  ;;  %v1472_v41 = vpop.f32.mrf.mxu1  ;;  %p2321_p5 = por %p2320_p4, %p2319_p3 }
 0x263   :  { %1697 = vrot.lane.b32.xlu1 %v1321_v36, %s2354_s4  ;;  %1699 = vrot.lane.b32.xlu0 %v1397_v39, %s2354_s4  ;;  %v1473_v46 = vadd.f32 %v1472_v41, %v864_v21  ;;  %v1643_v50 = vrot.slane %v1636_v42, %v2447_v18 }
 0x264   :  { %v2159_v43 = vpop.f32.mrf.mxu1  ;;  %v1548_v44 = vpop.f32.mrf.mxu0  ;;  %p2322_p6 = pnand %p2321_p5, %p2315_p2 }
 0x265   :  { %v1549_v47 = vadd.f32 %v1548_v44, %v940_v23  ;;  %v1660_v58 = vcombine.low %v1635_v54, %v1643_v50 }
 0x266   :  { %v2164_v48 = vpop.f32.mrf.mxu0  ;;  %v1624_v49 = vpop.f32.mrf.mxu1 }
 0x267   :  { %v1644_v51 = vcombine.low %v1397_v39, %v1549_v47  ;;  %v1625_v52 = vadd.f32 %v1624_v49, %v1016_v25  ;;  %1701 = vrot.lane.b32.xlu1 %v1473_v46, %s2354_s4  ;;  %1703 = vrot.lane.b32.xlu0 %v1549_v47, %s2354_s4  ;;  %v1667_v60 = vrot.slane %v1660_v58, %v2449_v19 }
 0x268   :  { %v2169_v53 = vpop.f32.mrf.mxu1 }
 0x269   :  { %v1652_v55 = vcombine.low %v1473_v46, %v1625_v52  ;;  %v1651_v56 = vrot.slane %v1644_v51, %v2447_v18 }
 0x26b   :  { %v1659_v57 = vrot.slane %v1652_v55, %v2447_v18  ;;  %1705 = vrot.lane.b32.xlu1 %v1625_v52, %s2354_s4 }
 0x26d   :  { %v1668_v59 = vcombine.low %v1651_v56, %v1659_v57 }
 0x26f   :  { %v1675_v61 = vrot.slane %v1668_v59, %v2449_v19 }
 0x271   :  { %v1677_v62 = vcombine.high %v1667_v60, %v1675_v61  ;;  %v1676_v63 = vcombine.low %v1667_v60, %v1675_v61 }
 0x273   :  { %1679 = vrot.lane.b32.xlu0 %v1677_v62, %s2347_s10 }
 0x2cd   :  { %v1692_v1 = vpop.permute.xlu1 %1691 }
 0x2d1   :  { %v1694_v2 = vpop.permute.xlu1 %1693  ;;  %v1696_v3 = vpop.permute.xlu0 %1695 }
 0x2d2   :  { %v1715_v9 = vcombine.low %v1692_v1, %v1696_v3 }
 0x2d4   :  { %v1722_v15 = vrot.slane %v1715_v9, %v2447_v18 }
 0x2d5   :  { %v1698_v4 = vpop.permute.xlu1 %1697  ;;  %v1700_v5 = vpop.permute.xlu0 %1699 }
 0x2d6   :  { %v1723_v6 = vcombine.low %v1694_v2, %v1698_v4 }
 0x2d8   :  { %v1730_v10 = vrot.slane %v1723_v6, %v2447_v18 }
 0x2d9   :  { %v1702_v7 = vpop.permute.xlu1 %1701  ;;  %v1704_v8 = vpop.permute.xlu0 %1703 }
 0x2da   :  { %v1731_v11 = vcombine.low %v1700_v5, %v1704_v8  ;;  %v1747_v17 = vcombine.low %v1722_v15, %v1730_v10 }
 0x2dc   :  { %v1738_v20 = vrot.slane %v1731_v11, %v2447_v18  ;;  %v1754_v23 = vrot.slane %v1747_v17, %v2449_v19 }
 0x2dd   :  { %v1706_v14 = vpop.permute.xlu1 %1705 }
 0x2de   :  { %v1739_v16 = vcombine.low %v1702_v7, %v1706_v14 }
 0x2e0   :  { %v1746_v21 = vrot.slane %v1739_v16, %v2447_v18 }
 0x2e2   :  { %v1755_v22 = vcombine.low %v1738_v20, %v1746_v21 }
 0x2e4   :  { %v1762_v24 = vrot.slane %v1755_v22, %v2449_v19 }
 0x2e5   :  { %v1680_v27 = vpop.permute.xlu0 %1679 }
 0x2e6   :  { %v1764_v25 = vcombine.high %v1754_v23, %v1762_v24  ;;  %v1763_v26 = vcombine.low %v1754_v23, %v1762_v24  ;;  %v1682_v28 = vsel %vm410_vm3, %v1676_v63, %v1680_v27 }
 0x2e8   :  { %1766 = vrot.lane.b32.xlu1 %v1764_v25, %s2347_s10 }
 0x311   :  { %1878 = vxpose.xlu1.b32.start.end [1/1] (short) (narrow) %v1682_v28, 8 }
 0x35a   :  { %v1767_v29 = vpop.permute.xlu1 %1766 }
 0x35b   :  { %v1769_v0 = vsel %vm410_vm3, %v1763_v26, %v1767_v29 }
 0x35c   :  { %1772 = vxpose.xlu0.b32.start.end [1/1] (short) (narrow) %v1769_v0, 8 }
 0x38d   :  { %v1894_v30 = vpop.trf.xlu1 }
 0x38e   :  { %2178 = vmatmul.mubr.msk.f32.vlgmr.msra.gmra.mxu1 %vm1804_vm4, %v1894_v30 }
 0x3d8   :  { %v1788_v18 = vpop.trf.xlu0 }
 0x3d9   :  { %2173 = vmatmul.mubr.msk.f32.vlgmr.msra.gmra.mxu0 %vm1804_vm4, %v1788_v18 }
 0x44e   :  { %v1979_v31 = vpop.f32.mrf.mxu1 }
 0x450   :  { %v2179_v32 = vpop.f32.mrf.mxu1 }
 0x499   :  { %v1874_v19 = vpop.f32.mrf.mxu0 }
 0x49a   :  { %v1980_v33 = vadd.f32 %v1979_v31, %v1874_v19 }
 0x49b   :  { %v2174_v34 = vpop.f32.mrf.mxu0 }
 0x49c   :  { %1983 = vst.msk [vmem:[#allocation13] sm:$0xff] %vm103_vm1, %v1980_v33 }
 0x49d   :  { %2325 = shalt.err (!%p2322_p6)
}
 0x49e   :  { %1993 = dma.vmem_to_hbm [thread:$0]  %s1991_s30, 128, %s2595_s7, [#allocation4]  }
 0x49f   :  { %2342 = dma.done.wait [#allocation4], 128  }
 0x4a0   :  { %2343 = vsyncadd [#allocation4], 4294967168 }
 0x4a1   :  { %1997 = vsyncpa [#allocation3], 1 }
 0x4a2   :  { %1998 = vsyncpa [#allocation6], 1 }
 0x4a3   :  { %1999 = vsyncpa [#allocation9], 1 }
 0x4a4   :  { %2000 = vsyncpa [#allocation12], 1 }
 0x4a5   :  { %2001 = vsyncpa [#allocation4], 1 }

// kernel: tpu_custom_call.1
= control target key start
LH: loop header
LB: loop body
LE: loop exit
PB: predicated region body
PF: predicated region fallthrough
CT: control target
= control target key end

     0   :  { %12 = vsyncpa [#allocation3], 0  ;;  %s2588_s0 = inlined_call_operand.hbm [shape: f32[8,16], index: 0, kind: input, shape index: {}]   ;;  %s2589_s1 = inlined_call_operand.hbm [shape: f32[8,16], index: 1, kind: input, shape index: {}]   ;;  %s2590_s2 = inlined_call_operand.hbm [shape: f32[8,16], index: 2, kind: input, shape index: {}]   ;;  %s2591_s3 = inlined_call_operand.hbm [shape: f32[8,4,8], index: 3, kind: input, shape index: {}]   ;;  %s2592_s4 = inlined_call_operand.hbm [shape: f32[8,4,8], index: 4, kind: input, shape index: {}]   ;;  %s2593_s5 = inlined_call_operand.vmem [shape: f32[8,16], index: 5, kind: input, shape index: {}]   ;;  %s2594_s6 = inlined_call_operand.hbm [shape: f32[8,16], index: 6, kind: input, shape index: {}]   ;;  %s2595_s7 = inlined_call_operand.hbm [shape: f32[8,16], index: 7, kind: output, shape index: {}]  }
   0x1   :  { %13 = vsyncpa [#allocation6], 0 }
   0x2   :  { %14 = vsyncpa [#allocation9], 0 }
   0x3   :  { %15 = vsyncpa [#allocation12], 0 }
   0x4   :  { %16 = vsyncpa [#allocation4], 0  ;;  %s2344_s24 = smov [#allocation5]   ;;  %s2345_s26 = smov [#allocation8]  }
   0x5   :  { %s33_s25 = sshll.u32 %s2344_s24, 4  ;;  %s52_s27 = sshll.u32 %s2345_s26, 4  ;;  %s34_s25 = int_to_ptr.vmem [resolvable:$true] %s33_s25  ;;  %s53_s27 = int_to_ptr.vmem [resolvable:$true] %s52_s27 }
   0x6   :  { %s2202_s28 = scalar_lea.vmem %s34_s25, 128  ;;  %p2207_p1 = scmp.lt.s32.totalorder %s34_s25, %s34_s25 }
   0x7   :  { %p2203_p0 = scmp.ne.s32.totalorder %s34_s25, %s2202_s28  ;;  %p2208_p2 = scmp.lt.s32.totalorder %s2202_s28, %s2202_s28 }
   0x9   :  { %p2209_p3 = por %p2208_p2, %p2207_p1 }
   0xb   :  { %p2210_p4 = pnand %p2209_p3, %p2203_p0 }
   0xd   :  { %2213 = shalt.err (!%p2210_p4)
}
   0xe   :  { %36 = dma.hbm_to_vmem [thread:$0]  %s2589_s1, 128, %s34_s25, [#allocation6]  }
   0xf   :  { %s2222_s8 = scalar_lea.vmem %s53_s27, 512  ;;  %p2227_p6 = scmp.lt.s32.totalorder %s53_s27, %s53_s27 }
  0x10   :  { %p2223_p5 = scmp.ne.s32.totalorder %s53_s27, %s2222_s8  ;;  %p2228_p7 = scmp.lt.s32.totalorder %s2222_s8, %s2222_s8 }
  0x12   :  { %p2229_p8 = por %p2228_p7, %p2227_p6 }
  0x14   :  { %p2230_p9 = pnand %p2229_p8, %p2223_p5 }
  0x16   :  { %2233 = shalt.err (!%p2230_p9)
}
  0x17   :  { %s2346_s9 = smov 64   ;;  %s2347_s10 = smov 4  }
  0x18   :  { %58 = dma.hbm_to_vmem [thread:$0]  %s2591_s3, 512, %s53_s27, [#allocation9], %s2346_s9, %s2346_s9, %s2347_s10  }
  0x19   :  { %s2348_s13 = smov [#allocation2]   ;;  %s2349_s15 = smov [#allocation7]  }
  0x1a   :  { %s23_s14 = sshll.u32 %s2348_s13, 4  ;;  %s43_s1 = sshll.u32 %s2349_s15, 4  ;;  %s24_s14 = int_to_ptr.vmem [resolvable:$true] %s23_s14  ;;  %s44_s1 = int_to_ptr.vmem [resolvable:$true] %s43_s1 }
  0x1b   :  { %s2242_s16 = scalar_lea.vmem %s24_s14, 128  ;;  %p2247_p11 = scmp.lt.s32.totalorder %s24_s14, %s24_s14 }
  0x1c   :  { %p2243_p10 = scmp.ne.s32.totalorder %s24_s14, %s2242_s16  ;;  %p2248_p12 = scmp.lt.s32.totalorder %s2242_s16, %s2242_s16 }
  0x1e   :  { %p2249_p13 = por %p2248_p12, %p2247_p11 }
  0x20   :  { %p2250_p0 = pnand %p2249_p13, %p2243_p10 }
  0x22   :  { %2253 = shalt.err (!%p2250_p0)
}
  0x23   :  { %26 = dma.hbm_to_vmem [thread:$0]  %s2588_s0, 128, %s24_s14, [#allocation3]  }
  0x24   :  { %s2262_s19 = scalar_lea.vmem %s44_s1, 128  ;;  %p2267_p2 = scmp.lt.s32.totalorder %s44_s1, %s44_s1 }
  0x25   :  { %p2263_p1 = scmp.ne.s32.totalorder %s44_s1, %s2262_s19  ;;  %p2268_p3 = scmp.lt.s32.totalorder %s2262_s19, %s2262_s19 }
  0x27   :  { %p2269_p4 = por %p2268_p3, %p2267_p2 }
  0x29   :  { %p2270_p5 = pnand %p2269_p4, %p2263_p1 }
  0x2b   :  { %2273 = shalt.err (!%p2270_p5)
}
  0x2c   :  { %46 = dma.hbm_to_vmem [thread:$0]  %s2590_s2, 128, %s44_s1, [#allocation6]  }
  0x2d   :  { %s2350_s21 = smov [#allocation10]   ;;  %s2351_s23 = smov [#allocation11]  }
  0x2e   :  { %s64_s22 = sshll.u32 %s2350_s21, 4  ;;  %s79_s24 = sshll.u32 %s2351_s23, 4  ;;  %s65_s22 = int_to_ptr.vmem [resolvable:$true] %s64_s22  ;;  %s80_s24 = int_to_ptr.vmem [resolvable:$true] %s79_s24 }
  0x2f   :  { %s2282_s25 = scalar_lea.vmem %s65_s22, 512  ;;  %p2287_p7 = scmp.lt.s32.totalorder %s65_s22, %s65_s22 }
  0x30   :  { %p2283_p6 = scmp.ne.s32.totalorder %s65_s22, %s2282_s25  ;;  %p2288_p8 = scmp.lt.s32.totalorder %s2282_s25, %s2282_s25 }
  0x32   :  { %p2289_p9 = por %p2288_p8, %p2287_p7 }
  0x34   :  { %p2290_p10 = pnand %p2289_p9, %p2283_p6 }
  0x36   :  { %2293 = shalt.err (!%p2290_p10)
}
  0x37   :  { %70 = dma.hbm_to_vmem [thread:$0]  %s2592_s4, 512, %s65_s22, [#allocation9], %s2346_s9, %s2346_s9, %s2347_s10  }
  0x38   :  { %s2302_s2 = scalar_lea.vmem %s80_s24, 128  ;;  %p2307_p12 = scmp.lt.s32.totalorder %s80_s24, %s80_s24 }
  0x39   :  { %p2303_p11 = scmp.ne.s32.totalorder %s80_s24, %s2302_s2  ;;  %p2308_p13 = scmp.lt.s32.totalorder %s2302_s2, %s2302_s2 }
  0x3b   :  { %p2309_p0 = por %p2308_p13, %p2307_p12 }
  0x3d   :  { %p2310_p1 = pnand %p2309_p0, %p2303_p11 }
  0x3f   :  { %2313 = shalt.err (!%p2310_p1)
}
  0x40   :  { %82 = dma.hbm_to_vmem [thread:$0]  %s2594_s6, 128, %s80_s24, [#allocation12]  }
  0x41   :  { %2334 = dma.done.wait [#allocation3], 128  }
  0x42   :  { %2335 = vsyncadd [#allocation3], 4294967168 }
  0x43   :  { %2336 = dma.done.wait [#allocation6], 256  }
  0x44   :  { %2337 = vsyncadd [#allocation6], 4294967040 }
  0x45   :  { %2338 = dma.done.wait [#allocation9], 1024  }
  0x46   :  { %2339 = vsyncadd [#allocation9], 4294966272 }
  0x47   :  { %2340 = dma.done.wait [#allocation12], 128  }
  0x48   :  { %2341 = vsyncadd [#allocation12], 4294967168  ;;  %v2352_v0 = vmov 0.0   ;;  %vm2353_vm0 = vmmov 0   ;;  %vm103_vm1 = vcmask 130048   ;;  %v101_v1 = vld [vmem:[#allocation2] sm:$0xff]  ;;  %v262_v12 = vlaneseq }
  0x49   :  { %2085 = vmatprep.subr.mxu1 %v2352_v0  ;;  %2087 = vmatprep.mubr.msk.f32.mxu1 %vm2353_vm0, %v2352_v0  ;;  %v180_v2 = vld [vmem:[#allocation7] sm:$0xff]  ;;  %v102_v3 = vld [vmem:[#allocation5] sm:$0xff]  ;;  %v402_v4 = vld [vmem:[#allocation10] sm:$0xf]  ;;  %vm414_vm2 = vcmask 1043456   ;;  %s2354_s4 = smov 124  }
  0x4a   :  { %2080 = vmatprep.subr.mxu0 %v2352_v0  ;;  %2082 = vmatprep.mubr.msk.f32.mxu0 %vm2353_vm0, %v2352_v0  ;;  %v403_v5 = vld [vmem:[#allocation10 + $0x4] sm:$0xf]  ;;  %v2355_v10 = vmov 1983009808   ;;  %v2356_v13 = vmov 1934713408  }
  0x4b   :  { %2086 = vmatpush3.xpose.msk.msra.mxu1 %vm103_vm1, %v101_v1  ;;  %2081 = vmatpush3.xpose.msk.msra.mxu0 %vm103_vm1, %v101_v1  ;;  %v260_v11 = vunpack.c.l.s4 %v2355_v10  ;;  %v291_v14 = vunpack.c.l.s4 %v2356_v13  ;;  %v263_v16 = vshrl.u32 %v262_v12, 7  ;;  %vm410_vm3 = vcmask 31744   ;;  %v404_v30 = vld [vmem:[#allocation10 + $0x8] sm:$0xf]  ;;  %v405_v34 = vld [vmem:[#allocation10 + $0xc] sm:$0xf] }
  0x4c   :  { %2090 = vmatprep.subr.mxu0 %v2352_v0  ;;  %2095 = vmatprep.subr.mxu1 %v2352_v0  ;;  %v406_v36 = vld [vmem:[#allocation10 + $0x10] sm:$0xf]  ;;  %v407_v41 = vld [vmem:[#allocation10 + $0x14] sm:$0xf]  ;;  %v408_v43 = vld [vmem:[#allocation10 + $0x18] sm:$0xf] }
  0x4d   :  { %v261_v15 = vunpack.c.0.s8 %v260_v11  ;;  %v292_v17 = vunpack.c.0.s8 %v291_v14  ;;  %v409_v48 = vld [vmem:[#allocation10 + $0x1c] sm:$0xf]  ;;  %v394_v50 = vld [vmem:[#allocation8] sm:$0xf]  ;;  %v395_v55 = vld [vmem:[#allocation8 + $0x4] sm:$0xf] }
  0x4e   :  { %2088 = vmatmul.mubr.msk.f32.vlgmr.msra.gmra.mxu1 %vm103_vm1, %v180_v2  ;;  %2083 = vmatmul.mubr.msk.f32.vlgmr.msra.gmra.mxu0 %vm103_vm1, %v102_v3  ;;  %v396_v57 = vld [vmem:[#allocation8 + $0x8] sm:$0xf]  ;;  %v397_v61 = vld [vmem:[#allocation8 + $0xc] sm:$0xf]  ;;  %v398_v62 = vld [vmem:[#allocation8 + $0x10] sm:$0xf] }
  0x4f   :  { %2092 = vmatprep.mubr.msk.f32.mxu0 %vm2353_vm0, %v2352_v0  ;;  %2097 = vmatprep.mubr.msk.f32.mxu1 %vm2353_vm0, %v2352_v0  ;;  %v2447_v18 = vsub.s32 %v261_v15, %v263_v16  ;;  %v2449_v19 = vsub.s32 %v292_v17, %v263_v16  ;;  %v399_v3 = vld [vmem:[#allocation8 + $0x14] sm:$0xf]  ;;  %vm1804_vm4 = vcmask 64512  }
  0x50   :  { %2091 = vmatpush3.msk.msra.mxu0 %vm414_vm2, %v402_v4  ;;  %2096 = vmatpush3.msk.msra.mxu1 %vm414_vm2, %v403_v5  ;;  %v400_v4 = vld [vmem:[#allocation8 + $0x18] sm:$0xf] }
  0x51   :  { %2100 = vmatprep.subr.mxu0 %v2352_v0  ;;  %2105 = vmatprep.subr.mxu1 %v2352_v0 }
 0x10e   :  { %v250_v6 = vpop.f32.mrf.mxu1  ;;  %v2442_v7 = vpop.f32.mrf.mxu0 }
 0x10f   :  { %325 = vrot.lane.b32.xlu0 %v250_v6, %s2354_s4  ;;  %v328_v21 = vcombine.high %v250_v6, %v2352_v0  ;;  %v335_v22 = vrot.slane %v250_v6, %v2447_v18  ;;  %v265_v42 = vrot.slane %v2442_v7, %v2447_v18  ;;  %v258_v49 = vcombine.high %v2442_v7, %v2352_v0 }
 0x110   :  { %v2089_v8 = vpop.f32.mrf.mxu1  ;;  %v2084_v9 = vpop.f32.mrf.mxu0 }
 0x111   :  { %v342_v28 = vrot.slane %v328_v21, %v2447_v18  ;;  %v272_v56 = vrot.slane %v258_v49, %v2447_v18 }
 0x113   :  { %255 = vrot.lane.b32.xlu0 %v2442_v7, %s2354_s4  ;;  %v401_v7 = vld [vmem:[#allocation8 + $0x1c] sm:$0xf] }
 0x181   :  { %v326_v20 = vpop.permute.xlu0 %325 }
 0x182   :  { %v343_v23 = vcombine.high %v326_v20, %v2352_v0  ;;  %v350_v24 = vrot.slane %v326_v20, %v2447_v18 }
 0x184   :  { %v357_v25 = vrot.slane %v343_v23, %v2447_v18  ;;  %v358_v26 = vcombine.low %v335_v22, %v350_v24  ;;  %v359_v27 = vcombine.high %v335_v22, %v350_v24 }
 0x185   :  { %v256_v35 = vpop.permute.xlu0 %255 }
 0x186   :  { %v366_v29 = vrot.slane %v358_v26, %v2449_v19  ;;  %v373_v31 = vrot.slane %v359_v27, %v2449_v19  ;;  %v374_v32 = vcombine.low %v342_v28, %v357_v25  ;;  %v375_v37 = vcombine.high %v342_v28, %v357_v25 }
 0x187   :  { %v280_v40 = vrot.slane %v256_v35, %v2447_v18  ;;  %v273_v44 = vcombine.high %v256_v35, %v2352_v0 }
 0x188   :  { %v390_v33 = vcombine.high %v366_v29, %v2352_v0  ;;  %2093 = vmatmul.mubr.msk.f32.vlgmr.msra.gmra.mxu0 %vm410_vm3, %v366_v29  ;;  %v382_v38 = vrot.slane %v374_v32, %v2449_v19  ;;  %v391_v39 = vcombine.high %v373_v31, %v2352_v0  ;;  %v389_v45 = vrot.slane %v375_v37, %v2449_v19 }
 0x189   :  { %2101 = vmatpush3.msk.msra.mxu0 %vm414_vm2, %v404_v30  ;;  %2102 = vmatprep.mubr.msk.f32.mxu0 %vm2353_vm0, %v2352_v0  ;;  %v288_v47 = vcombine.low %v265_v42, %v280_v40  ;;  %v287_v51 = vrot.slane %v273_v44, %v2447_v18  ;;  %v289_v53 = vcombine.high %v265_v42, %v280_v40 }
 0x18a   :  { %2098 = vmatmul.mubr.msk.f32.vlgmr.msra.gmra.mxu1 %vm410_vm3, %v390_v33  ;;  %2110 = vmatprep.subr.mxu0 %v2352_v0  ;;  %v392_v46 = vcombine.high %v382_v38, %v2352_v0  ;;  %v393_v52 = vcombine.high %v389_v45, %v2352_v0 }
 0x18b   :  { %2106 = vmatpush3.msk.msra.mxu1 %vm414_vm2, %v405_v34  ;;  %2107 = vmatprep.mubr.msk.f32.mxu1 %vm2353_vm0, %v2352_v0  ;;  %v296_v54 = vrot.slane %v288_v47, %v2449_v19  ;;  %v303_v58 = vrot.slane %v289_v53, %v2449_v19  ;;  %v304_v59 = vcombine.low %v272_v56, %v287_v51 }
 0x18c   :  { %2103 = vmatmul.mubr.msk.f32.vlgmr.msra.gmra.mxu0 %vm410_vm3, %v373_v31  ;;  %2115 = vmatprep.subr.mxu1 %v2352_v0  ;;  %v305_v63 = vcombine.high %v272_v56, %v287_v51 }
 0x18d   :  { %2111 = vmatpush3.msk.msra.mxu0 %vm414_vm2, %v406_v36  ;;  %2112 = vmatprep.mubr.msk.f32.mxu0 %vm2353_vm0, %v2352_v0  ;;  %v320_v60 = vcombine.high %v296_v54, %v2352_v0  ;;  %v312_v1 = vrot.slane %v304_v59, %v2449_v19  ;;  %v321_v2 = vcombine.high %v303_v58, %v2352_v0 }
 0x18e   :  { %2108 = vmatmul.mubr.msk.f32.vlgmr.msra.gmra.mxu1 %vm410_vm3, %v391_v39  ;;  %2120 = vmatprep.subr.mxu0 %v2352_v0  ;;  %v319_v5 = vrot.slane %v305_v63, %v2449_v19 }
 0x18f   :  { %2116 = vmatpush3.msk.msra.mxu1 %vm414_vm2, %v407_v41  ;;  %2117 = vmatprep.mubr.msk.f32.mxu1 %vm2353_vm0, %v2352_v0  ;;  %v322_v6 = vcombine.high %v312_v1, %v2352_v0 }
 0x190   :  { %2113 = vmatmul.mubr.msk.f32.vlgmr.msra.gmra.mxu0 %vm410_vm3, %v382_v38  ;;  %2125 = vmatprep.subr.mxu1 %v2352_v0  ;;  %v323_v8 = vcombine.high %v319_v5, %v2352_v0 }
 0x191   :  { %2121 = vmatpush3.msk.msra.mxu0 %vm414_vm2, %v408_v43  ;;  %2122 = vmatprep.mubr.msk.f32.mxu0 %vm2353_vm0, %v2352_v0 }
 0x192   :  { %2118 = vmatmul.mubr.msk.f32.vlgmr.msra.gmra.mxu1 %vm410_vm3, %v392_v46  ;;  %2130 = vmatprep.subr.mxu0 %v2352_v0 }
 0x193   :  { %2126 = vmatpush3.msk.msra.mxu1 %vm414_vm2, %v409_v48  ;;  %2127 = vmatprep.mubr.msk.f32.mxu1 %vm2353_vm0, %v2352_v0 }
 0x194   :  { %2123 = vmatmul.mubr.msk.f32.vlgmr.msra.gmra.mxu0 %vm410_vm3, %v389_v45  ;;  %2135 = vmatprep.subr.mxu1 %v2352_v0 }
 0x195   :  { %2131 = vmatpush3.msk.msra.mxu0 %vm414_vm2, %v394_v50  ;;  %2132 = vmatprep.mubr.msk.f32.mxu0 %vm2353_vm0, %v2352_v0 }
 0x196   :  { %2128 = vmatmul.mubr.msk.f32.vlgmr.msra.gmra.mxu1 %vm410_vm3, %v393_v52  ;;  %2140 = vmatprep.subr.mxu0 %v2352_v0 }
 0x197   :  { %2137 = vmatprep.mubr.msk.f32.mxu1 %vm2353_vm0, %v2352_v0  ;;  %2136 = vmatpush3.msk.msra.mxu1 %vm414_vm2, %v395_v55 }
 0x198   :  { %2133 = vmatmul.mubr.msk.f32.vlgmr.msra.gmra.mxu0 %vm410_vm3, %v296_v54  ;;  %2145 = vmatprep.subr.mxu1 %v2352_v0 }
 0x199   :  { %2142 = vmatprep.mubr.msk.f32.mxu0 %vm2353_vm0, %v2352_v0  ;;  %2141 = vmatpush3.msk.msra.mxu0 %vm414_vm2, %v396_v57 }
 0x19a   :  { %2138 = vmatmul.mubr.msk.f32.vlgmr.msra.gmra.mxu1 %vm410_vm3, %v320_v60  ;;  %2150 = vmatprep.subr.mxu0 %v2352_v0 }
 0x19b   :  { %2147 = vmatprep.mubr.msk.f32.mxu1 %vm2353_vm0, %v2352_v0  ;;  %2146 = vmatpush3.msk.msra.mxu1 %vm414_vm2, %v397_v61 }
 0x19c   :  { %2143 = vmatmul.mubr.msk.f32.vlgmr.msra.gmra.mxu0 %vm410_vm3, %v303_v58  ;;  %2155 = vmatprep.subr.mxu1 %v2352_v0 }
 0x19d   :  { %2152 = vmatprep.mubr.msk.f32.mxu0 %vm2353_vm0, %v2352_v0  ;;  %2151 = vmatpush3.msk.msra.mxu0 %vm414_vm2, %v398_v62 }
 0x19e   :  { %2148 = vmatmul.mubr.msk.f32.vlgmr.msra.gmra.mxu1 %vm410_vm3, %v321_v2  ;;  %2160 = vmatprep.subr.mxu0 %v2352_v0 }
 0x19f   :  { %2157 = vmatprep.mubr.msk.f32.mxu1 %vm2353_vm0, %v2352_v0  ;;  %2156 = vmatpush3.msk.msra.mxu1 %vm414_vm2, %v399_v3 }
 0x1a0   :  { %2153 = vmatmul.mubr.msk.f32.vlgmr.msra.gmra.mxu0 %vm410_vm3, %v312_v1  ;;  %2165 = vmatprep.subr.mxu1 %v2352_v0 }
 0x1a1   :  { %2162 = vmatprep.mubr.msk.f32.mxu0 %vm2353_vm0, %v2352_v0  ;;  %2161 = vmatpush3.msk.msra.mxu0 %vm414_vm2, %v400_v4 }
 0x1a2   :  { %2158 = vmatmul.mubr.msk.f32.vlgmr.msra.gmra.mxu1 %vm410_vm3, %v322_v6  ;;  %2170 = vmatprep.subr.mxu0 %v2352_v0 }
 0x1a3   :  { %2167 = vmatprep.mubr.msk.f32.mxu1 %vm2353_vm0, %v2352_v0  ;;  %2166 = vmatpush3.msk.msra.mxu1 %vm414_vm2, %v401_v7 }
 0x1a4   :  { %2163 = vmatmul.mubr.msk.f32.vlgmr.msra.gmra.mxu0 %vm410_vm3, %v319_v5  ;;  %2175 = vmatprep.subr.mxu1 %v2352_v0 }
 0x1a5   :  { %2172 = vmatprep.mubr.msk.f32.mxu0 %vm2353_vm0, %v2352_v0 }
 0x1a6   :  { %2168 = vmatmul.mubr.msk.f32.vlgmr.msra.gmra.mxu1 %vm410_vm3, %v323_v8 }
 0x1a7   :  { %2177 = vmatprep.mubr.msk.f32.mxu1 %vm2353_vm0, %v2352_v0 }
 0x248   :  { %v484_v9 = vpop.f32.mrf.mxu0 }
 0x24a   :  { %v2094_v10 = vpop.f32.mrf.mxu0  ;;  %v560_v11 = vpop.f32.mrf.mxu1 }
 0x24c   :  { %v2099_v12 = vpop.f32.mrf.mxu1  ;;  %v636_v13 = vpop.f32.mrf.mxu0 }
 0x24d   :  { %v1771_v12 = vld [vmem:[#allocation11] sm:$0xff] }
 0x24e   :  { %v2104_v14 = vpop.f32.mrf.mxu0  ;;  %v712_v15 = vpop.f32.mrf.mxu1  ;;  %2171 = vmatpush3.msra.mxu0 %v1771_v12 }
 0x250   :  { %v2109_v16 = vpop.f32.mrf.mxu1  ;;  %v788_v17 = vpop.f32.mrf.mxu0 }
 0x252   :  { %v2114_v20 = vpop.f32.mrf.mxu0  ;;  %v864_v21 = vpop.f32.mrf.mxu1 }
 0x254   :  { %v2119_v22 = vpop.f32.mrf.mxu1  ;;  %v940_v23 = vpop.f32.mrf.mxu0 }
 0x256   :  { %v2124_v24 = vpop.f32.mrf.mxu0  ;;  %v1016_v25 = vpop.f32.mrf.mxu1 }
 0x258   :  { %v2129_v26 = vpop.f32.mrf.mxu1  ;;  %v1092_v27 = vpop.f32.mrf.mxu0 }
 0x259   :  { %v1093_v28 = vadd.f32 %v1092_v27, %v484_v9 }
 0x25a   :  { %v2134_v29 = vpop.f32.mrf.mxu0  ;;  %v1168_v0 = vpop.f32.mrf.mxu1 }
 0x25b   :  { %1691 = vrot.lane.b32.xlu1 %v1093_v28, %s2354_s4  ;;  %v1169_v32 = vadd.f32 %v1168_v0, %v560_v11 }
 0x25c   :  { %v2139_v30 = vpop.f32.mrf.mxu1  ;;  %v1244_v31 = vpop.f32.mrf.mxu0 }
 0x25d   :  { %v1245_v33 = vadd.f32 %v1244_v31, %v636_v13  ;;  %v1770_v13 = vld [vmem:[%s2593_s5] sm:$0xff]  ;;  %s2357_s5 = smov [#allocation13]  }
 0x25e   :  { %v2144_v34 = vpop.f32.mrf.mxu0  ;;  %v1320_v35 = vpop.f32.mrf.mxu1  ;;  %2176 = vmatpush3.msra.mxu1 %v1770_v13  ;;  %s1990_s30 = sshll.u32 %s2357_s5, 4  ;;  %s1991_s30 = int_to_ptr.vmem [resolvable:$true] %s1990_s30 }
 0x25f   :  { %v1321_v36 = vadd.f32 %v1320_v35, %v712_v15  ;;  %1693 = vrot.lane.b32.xlu1 %v1169_v32, %s2354_s4  ;;  %1695 = vrot.lane.b32.xlu0 %v1245_v33, %s2354_s4  ;;  %v1628_v45 = vcombine.low %v1093_v28, %v1245_v33  ;;  %s2314_s8 = scalar_lea.vmem %s1991_s30, 128  ;;  %p2319_p3 = scmp.lt.s32.totalorder %s1991_s30, %s1991_s30 }
 0x260   :  { %v2149_v37 = vpop.f32.mrf.mxu1  ;;  %v1396_v38 = vpop.f32.mrf.mxu0  ;;  %p2315_p2 = scmp.ne.s32.totalorder %s1991_s30, %s2314_s8  ;;  %p2320_p4 = scmp.lt.s32.totalorder %s2314_s8, %s2314_s8 }
 0x261   :  { %v1397_v39 = vadd.f32 %v1396_v38, %v788_v17  ;;  %v1636_v42 = vcombine.low %v1169_v32, %v1321_v36  ;;  %v1635_v54 = vrot.slane %v1628_v45, %v2447_v18 }
 0x262   :  { %v2154_v40 = vpop.f32.mrf.mxu0  ;;  %v1472_v41 = vpop.f32.mrf.mxu1  ;;  %p2321_p5 = por %p2320_p4, %p2319_p3 }
 0x263   :  { %1697 = vrot.lane.b32.xlu1 %v1321_v36, %s2354_s4  ;;  %1699 = vrot.lane.b32.xlu0 %v1397_v39, %s2354_s4  ;;  %v1473_v46 = vadd.f32 %v1472_v41, %v864_v21  ;;  %v1643_v50 = vrot.slane %v1636_v42, %v2447_v18 }
 0x264   :  { %v2159_v43 = vpop.f32.mrf.mxu1  ;;  %v1548_v44 = vpop.f32.mrf.mxu0  ;;  %p2322_p6 = pnand %p2321_p5, %p2315_p2 }
 0x265   :  { %v1549_v47 = vadd.f32 %v1548_v44, %v940_v23  ;;  %v1660_v58 = vcombine.low %v1635_v54, %v1643_v50 }
 0x266   :  { %v2164_v48 = vpop.f32.mrf.mxu0  ;;  %v1624_v49 = vpop.f32.mrf.mxu1 }
 0x267   :  { %v1644_v51 = vcombine.low %v1397_v39, %v1549_v47  ;;  %v1625_v52 = vadd.f32 %v1624_v49, %v1016_v25  ;;  %1701 = vrot.lane.b32.xlu1 %v1473_v46, %s2354_s4  ;;  %1703 = vrot.lane.b32.xlu0 %v1549_v47, %s2354_s4  ;;  %v1667_v60 = vrot.slane %v1660_v58, %v2449_v19 }
 0x268   :  { %v2169_v53 = vpop.f32.mrf.mxu1 }
 0x269   :  { %v1652_v55 = vcombine.low %v1473_v46, %v1625_v52  ;;  %v1651_v56 = vrot.slane %v1644_v51, %v2447_v18 }
 0x26b   :  { %v1659_v57 = vrot.slane %v1652_v55, %v2447_v18  ;;  %1705 = vrot.lane.b32.xlu1 %v1625_v52, %s2354_s4 }
 0x26d   :  { %v1668_v59 = vcombine.low %v1651_v56, %v1659_v57 }
 0x26f   :  { %v1675_v61 = vrot.slane %v1668_v59, %v2449_v19 }
 0x271   :  { %v1677_v62 = vcombine.high %v1667_v60, %v1675_v61  ;;  %v1676_v63 = vcombine.low %v1667_v60, %v1675_v61 }
 0x273   :  { %1679 = vrot.lane.b32.xlu0 %v1677_v62, %s2347_s10 }
 0x2cd   :  { %v1692_v1 = vpop.permute.xlu1 %1691 }
 0x2d1   :  { %v1694_v2 = vpop.permute.xlu1 %1693  ;;  %v1696_v3 = vpop.permute.xlu0 %1695 }
 0x2d2   :  { %v1715_v9 = vcombine.low %v1692_v1, %v1696_v3 }
 0x2d4   :  { %v1722_v15 = vrot.slane %v1715_v9, %v2447_v18 }
 0x2d5   :  { %v1698_v4 = vpop.permute.xlu1 %1697  ;;  %v1700_v5 = vpop.permute.xlu0 %1699 }
 0x2d6   :  { %v1723_v6 = vcombine.low %v1694_v2, %v1698_v4 }
 0x2d8   :  { %v1730_v10 = vrot.slane %v1723_v6, %v2447_v18 }
 0x2d9   :  { %v1702_v7 = vpop.permute.xlu1 %1701  ;;  %v1704_v8 = vpop.permute.xlu0 %1703 }
 0x2da   :  { %v1731_v11 = vcombine.low %v1700_v5, %v1704_v8  ;;  %v1747_v17 = vcombine.low %v1722_v15, %v1730_v10 }
 0x2dc   :  { %v1738_v20 = vrot.slane %v1731_v11, %v2447_v18  ;;  %v1754_v23 = vrot.slane %v1747_v17, %v2449_v19 }
 0x2dd   :  { %v1706_v14 = vpop.permute.xlu1 %1705 }
 0x2de   :  { %v1739_v16 = vcombine.low %v1702_v7, %v1706_v14 }
 0x2e0   :  { %v1746_v21 = vrot.slane %v1739_v16, %v2447_v18 }
 0x2e2   :  { %v1755_v22 = vcombine.low %v1738_v20, %v1746_v21 }
 0x2e4   :  { %v1762_v24 = vrot.slane %v1755_v22, %v2449_v19 }
 0x2e5   :  { %v1680_v27 = vpop.permute.xlu0 %1679 }
 0x2e6   :  { %v1764_v25 = vcombine.high %v1754_v23, %v1762_v24  ;;  %v1763_v26 = vcombine.low %v1754_v23, %v1762_v24  ;;  %v1682_v28 = vsel %vm410_vm3, %v1676_v63, %v1680_v27 }
 0x2e8   :  { %1766 = vrot.lane.b32.xlu1 %v1764_v25, %s2347_s10 }
 0x311   :  { %1878 = vxpose.xlu1.b32.start.end [1/1] (short) (narrow) %v1682_v28, 8 }
 0x35a   :  { %v1767_v29 = vpop.permute.xlu1 %1766 }
 0x35b   :  { %v1769_v0 = vsel %vm410_vm3, %v1763_v26, %v1767_v29 }
 0x35c   :  { %1772 = vxpose.xlu0.b32.start.end [1/1] (short) (narrow) %v1769_v0, 8 }
 0x38d   :  { %v1894_v30 = vpop.trf.xlu1 }
 0x38e   :  { %2178 = vmatmul.mubr.msk.f32.vlgmr.msra.gmra.mxu1 %vm1804_vm4, %v1894_v30 }
 0x3d8   :  { %v1788_v18 = vpop.trf.xlu0 }
 0x3d9   :  { %2173 = vmatmul.mubr.msk.f32.vlgmr.msra.gmra.mxu0 %vm1804_vm4, %v1788_v18 }
 0x44e   :  { %v1979_v31 = vpop.f32.mrf.mxu1 }
 0x450   :  { %v2179_v32 = vpop.f32.mrf.mxu1 }
 0x499   :  { %v1874_v19 = vpop.f32.mrf.mxu0 }
 0x49a   :  { %v1980_v33 = vadd.f32 %v1979_v31, %v1874_v19 }
 0x49b   :  { %v2174_v34 = vpop.f32.mrf.mxu0 }
 0x49c   :  { %1983 = vst.msk [vmem:[#allocation13] sm:$0xff] %vm103_vm1, %v1980_v33 }
 0x49d   :  { %2325 = shalt.err (!%p2322_p6)
}
 0x49e   :  { %1993 = dma.vmem_to_hbm [thread:$0]  %s1991_s30, 128, %s2595_s7, [#allocation4]  }
 0x49f   :  { %2342 = dma.done.wait [#allocation4], 128  }
 0x4a0   :  { %2343 = vsyncadd [#allocation4], 4294967168 }
 0x4a1   :  { %1997 = vsyncpa [#allocation3], 1 }
 0x4a2   :  { %1998 = vsyncpa [#allocation6], 1 }
 0x4a3   :  { %1999 = vsyncpa [#allocation9], 1 }
 0x4a4   :  { %2000 = vsyncpa [#allocation12], 1 }
 0x4a5   :  { %2001 = vsyncpa [#allocation4], 1 }

</bundles_post_ra>
